<compile_context>
chip_gen: v6e
topology: v6e:2x2x1
jax: 0.10.0
libtpu: 0.0.40
codegen_flags: <defaults>
</compile_context>

<pallas_src>
import numpy as np
import jax
import jax.numpy as jnp
from jax import lax
from jax.experimental import pallas as pl
from jax.experimental.pallas import tpu as pltpu

_LANE = 128         # lane width every feature axis is padded to
_N_ACT = 8          # number of per-batch activation inputs (the rest are weights/biases)
_NEG = -1e30        # "minus infinity" that survives f32 arithmetic


def _round_up(x, m):
    return ((x + m - 1) // m) * m


def _pick_batch_block(B):
    B8 = _round_up(B, 8)
    if B8 <= 16:
        return B8
    # >= 2 grid steps (both v7x TensorCores get work), blocks multiple of 16
    # (bf16 sublane tile), capped at 64 rows for VMEM headroom.
    return int(min(64, _round_up(B8 // 2, 16)))


def _pad2(x, r, c):
    return jnp.pad(x, ((0, r - x.shape[0]), (0, c - x.shape[1])))


def _pad3(x, a, b, c):
    return jnp.pad(x, ((0, a - x.shape[0]), (0, b - x.shape[1]), (0, c - x.shape[2])))


def apply_dropout(x, key, rate):
    """F.dropout(x, rate) with training=True semantics (inverted dropout)."""
    if rate <= 0.0:
        return x
    keep = jax.random.bernoulli(key, 1.0 - rate, x.shape)
    return jnp.where(keep, x / (1.0 - rate), 0.0)


def _shift_pz(pv_pz_proba):
    """Replicates shift(): prepend a 1e-10 row, drop the last timestep."""
    Tz, B, V = pv_pz_proba.shape
    first = jnp.full((1, B, V), 1e-10, jnp.float32)
    return jnp.concatenate([first, pv_pz_proba[:-1]], axis=0)


# -----------------------------------------------------------------------------
# Shared forward math (used by the Pallas kernel body AND the XLA parity check).
# All arrays are already padded: feature axes -> 128 lanes, batch -> block size,
# time -> x8.  Matmul operands bf16, accumulation f32, elementwise math f32.
# `pvp` may be a VMEM Ref (kernel) or an array (reference): only pvp[t] is used.
# -----------------------------------------------------------------------------
def _decoder_forward_math(xh, u_enc, m_enc, pvz, u_ids, m_ids, pvp, eps,
                          w_gru, b_gru, w1, b1,
                          p1w, p1b, p2w, p2b, p3w, p3b,
                          w_ms, b_ms,
                          *, V_real, Tu_real, Tm_real, Tz_real,
                          E_p, H_p, in_kernel):
    f32, bf16 = jnp.float32, jnp.bfloat16
    B = xh.shape[0]
    V_p = w1.shape[1]
    h0 = xh[:, E_p:E_p + H_p]                                       # (B, H_p) f32

    # ---- fused single-step GRU: one MXU pass, gate blocks [r | z | n_in | n_hid] ----
    g = jnp.dot(xh.astype(bf16), w_gru, preferred_element_type=f32) + b_gru
    r = jax.nn.sigmoid(g[:, 0:H_p])
    z = jax.nn.sigmoid(g[:, H_p:2 * H_p])
    n = jnp.tanh(g[:, 2 * H_p:3 * H_p] + r * g[:, 3 * H_p:4 * H_p])
    h_new = (1.0 - z) * n + z * h0                                   # (B, H_p) f32
    h_new_b = h_new.astype(bf16)

    # ---- generation score (padded vocab lanes removed from the joint softmax) ----
    v_lane = lax.broadcasted_iota(jnp.int32, (B, V_p), 1)
    vocab_ok = v_lane < V_real
    v_lane_f = v_lane.astype(f32)
    gen = jnp.dot(h_new_b, w1, preferred_element_type=f32) + b1
    gen = jnp.where(vocab_ok, gen, _NEG)

    def branch_scores(enc, pw, pb, T_real):
        # enc: (T_p, B, H_p) bf16 in encoder-native layout.
        # MXU projection + tanh, then VPU multiply + lane reduce instead of a
        # batched M=1 dot_general, then one tiny (T_p, B) -> (B, T_p) transpose.
        T_p = enc.shape[0]
        pr = jnp.dot(enc.reshape(T_p * B, H_p), pw, preferred_element_type=f32) + pb
        pr = jnp.tanh(pr).reshape(T_p, B, H_p)
        s = jnp.sum(pr * h_new[None, :, :], axis=-1)                 # (T_p, B)
        s = jnp.transpose(s)                                         # (B, T_p)
        t_lane = lax.broadcasted_iota(jnp.int32, s.shape, 1)
        return jnp.where(t_lane < T_real, s, _NEG), t_lane           # kill padded timesteps

    def um_copy_score(enc, pw, pb, ids, T_real):
        # log( exp(s - smax) @ sparse_{1,1e-10} ) + smax with the (B, T, V) mask
        # replaced by a T-step scatter accumulation + analytic 1e-10 background.
        s, t_lane = branch_scores(enc, pw, pb, T_real)
        smax = jnp.max(s, axis=1, keepdims=True)                     # (B, 1)
        e = jnp.exp(s - smax)                                        # 0 at padded timesteps
        tot = jnp.sum(e, axis=1, keepdims=True)                      # (B, 1)
        ids_f = ids.astype(f32)                                      # exact for ids < 2**24

        def body(t, acc):
            sel = t_lane == t
            e_t = jnp.sum(jnp.where(sel, e, 0.0), axis=1, keepdims=True)       # (B, 1)
            id_t = jnp.sum(jnp.where(sel, ids_f, 0.0), axis=1, keepdims=True)  # (B, 1)
            hit = jnp.logical_and(v_lane_f == id_t, id_t > 0.0)       # ignore_index == 0
            return acc + jnp.where(hit, e_t, 0.0)

        acc = lax.fori_loop(0, s.shape[1], body, jnp.zeros((B, V_p), f32))
        acc = acc * (1.0 - 1e-10) + 1e-10 * tot                      # exact sparse-mask semantics
        return jnp.where(vocab_ok, jnp.log(acc) + smax, _NEG)

    def pv_copy_score(enc, pw, pb, pv_proba, T_real):
        # Un-stabilized exp, exactly as the original force_stable branch for pv_z;
        # padded timesteps are exp(-1e30) == 0.  pv_proba stays f32 for log precision.
        s, t_lane = branch_scores(enc, pw, pb, T_real)
        e = jnp.exp(s)

        def body(t, acc):
            e_t = jnp.sum(jnp.where(t_lane == t, e, 0.0), axis=1, keepdims=True)
            return acc + e_t * pv_proba[t]                            # (B, V_p) f32 row

        acc = lax.fori_loop(0, s.shape[1], body, jnp.zeros((B, V_p), f32))
        return jnp.where(vocab_ok, jnp.log(acc), _NEG)

    u_copy = um_copy_score(u_enc, p1w, p1b, u_ids, Tu_real)
    m_copy = um_copy_score(m_enc, p2w, p2b, m_ids, Tm_real)
    pv_copy = pv_copy_score(pvz, p3w, p3b, pvp, Tz_real)

    # ---- joint softmax over [gen | u_copy | m_copy | pv_copy], elementwise ----
    mx = jnp.max(jnp.maximum(jnp.maximum(gen, u_copy), jnp.maximum(m_copy, pv_copy)),
                 axis=1, keepdims=True)
    num = (jnp.exp(gen - mx) + jnp.exp(u_copy - mx)
           + jnp.exp(m_copy - mx) + jnp.exp(pv_copy - mx))
    denom = jnp.sum(num, axis=1, keepdims=True)
    if in_kernel:
        proba = num * pl.reciprocal(denom, approx=True)               # divide -> EUP slot
    else:
        proba = num / denom

    # ---- fused mu / log_sigma projection + reparameterized sample ----
    ms = jnp.dot(proba.astype(bf16), w_ms, preferred_element_type=f32) + b_ms
    appr = ms[:, 0:E_p]
    log_sigma = ms[:, E_p:2 * E_p]
    sampled = appr + jnp.exp(log_sigma) * eps
    return sampled, h_new, proba, appr, log_sigma


# -----------------------------------------------------------------------------
# Pallas kernel
# -----------------------------------------------------------------------------
def _make_kernel(V_real, Tu_real, Tm_real, Tz_real, E_p, H_p):
    def kernel(xh_ref, u_enc_ref, m_enc_ref, pvz_ref, u_ids_ref, m_ids_ref,
               pvp_ref, eps_ref,
               wg_ref, bg_ref, w1_ref, b1_ref,
               p1w_ref, p1b_ref, p2w_ref, p2b_ref, p3w_ref, p3b_ref,
               wms_ref, bms_ref,
               samp_ref, gru_ref, proba_ref, appr_ref, ls_ref):
        sampled, h_new, proba, appr, log_sigma = _decoder_forward_math(
            xh_ref[...], u_enc_ref[...], m_enc_ref[...], pvz_ref[...],
            u_ids_ref[...], m_ids_ref[...], pvp_ref, eps_ref[...],
            wg_ref[...], bg_ref[...], w1_ref[...], b1_ref[...],
            p1w_ref[...], p1b_ref[...], p2w_ref[...], p2b_ref[...],
            p3w_ref[...], p3b_ref[...], wms_ref[...], bms_ref[...],
            V_real=V_real, Tu_real=Tu_real, Tm_real=Tm_real, Tz_real=Tz_real,
            E_p=E_p, H_p=H_p, in_kernel=True)
        samp_ref[...] = sampled
        gru_ref[...] = h_new
        proba_ref[...] = proba
        appr_ref[...] = appr
        ls_ref[...] = log_sigma
    return kernel


# -----------------------------------------------------------------------------
# Parameters (raw PyTorch layout) and padded / fused / bf16 kernel parameters
# -----------------------------------------------------------------------------
def init_params(key, embed_size, hidden_size, vocab_size):
    E, H, V = embed_size, hidden_size, vocab_size
    ks = jax.random.split(key, 10)

    def lin(k, in_dim, out_dim):
        k1, k2 = jax.random.split(k)
        bound = 1.0 / np.sqrt(in_dim)
        return (jax.random.uniform(k1, (out_dim, in_dim), jnp.float32, -bound, bound),
                jax.random.uniform(k2, (out_dim,), jnp.float32, -bound, bound))

    bound = 1.0 / np.sqrt(H)
    w_ih = jax.random.uniform(ks[0], (3 * H, E), jnp.float32, -bound, bound)
    w_hh = jax.random.uniform(ks[1], (3 * H, H), jnp.float32, -bound, bound)
    b_ih = jax.random.uniform(ks[2], (3 * H,), jnp.float32, -bound, bound)
    b_hh = jax.random.uniform(ks[3], (3 * H,), jnp.float32, -bound, bound)
    w1, b1 = lin(ks[4], H, V)
    p1w, p1b = lin(ks[5], H, H)
    p2w, p2b = lin(ks[6], H, H)
    p3w, p3b = lin(ks[7], H, H)
    mu_w, mu_b = lin(ks[8], V, E)
    ls_w, ls_b = lin(ks[9], V, E)
    return dict(w_ih=w_ih, w_hh=w_hh, b_ih=b_ih, b_hh=b_hh, w1=w1, b1=b1,
                p1w=p1w, p1b=p1b, p2w=p2w, p2b=p2b, p3w=p3w, p3b=p3b,
                mu_w=mu_w, mu_b=mu_b, ls_w=ls_w, ls_b=ls_b)


def _prepare_padded_params(p, E, H, V, E_p, H_p, V_p):
    f32, bf16 = jnp.float32, jnp.bfloat16

    def pad_w(w_t, in_p, out_p):               # (in, out) -> (in_p, out_p)
        return _pad2(w_t.astype(f32), in_p, out_p)

    def pad_b(b, out_p):                       # (out,) -> (1, out_p)
        return jnp.pad(b.astype(f32), (0, out_p - b.shape[0]))[None, :]

    # --- fused GRU weight (E_p+H_p, 4*H_p); column blocks [r | z | n_in | n_hid] ---
    wih_t = p['w_ih'].T.astype(f32)            # (E, 3H), gate columns [r | z | n]
    whh_t = p['w_hh'].T.astype(f32)            # (H, 3H)

    def gate_block(wt, gate, in_p):
        return _pad2(wt[:, gate * H:(gate + 1) * H], in_p, H_p)

    top = jnp.concatenate([gate_block(wih_t, 0, E_p), gate_block(wih_t, 1, E_p),
                           gate_block(wih_t, 2, E_p), jnp.zeros((E_p, H_p), f32)], axis=1)
    bot = jnp.concatenate([gate_block(whh_t, 0, H_p), gate_block(whh_t, 1, H_p),
                           jnp.zeros((H_p, H_p), f32), gate_block(whh_t, 2, H_p)], axis=1)
    w_gru = jnp.concatenate([top, bot], axis=0).astype(bf16)          # (E_p+H_p, 4*H_p)

    bih, bhh = p['b_ih'].astype(f32), p['b_hh'].astype(f32)
    b_gru = jnp.concatenate([
        pad_b(bih[0:H] + bhh[0:H], H_p),
        pad_b(bih[H:2 * H] + bhh[H:2 * H], H_p),
        pad_b(bih[2 * H:3 * H], H_p),
        pad_b(bhh[2 * H:3 * H], H_p)], axis=1)                        # (1, 4*H_p)

    # --- fused mu/log_sigma weight (V_p, 2*E_p) ---
    w_ms = jnp.concatenate([pad_w(p['mu_w'].T, V_p, E_p),
                            pad_w(p['ls_w'].T, V_p, E_p)], axis=1).astype(bf16)
    b_ms = jnp.concatenate([pad_b(p['mu_b'], E_p), pad_b(p['ls_b'], E_p)], axis=1)

    return dict(
        w_gru=w_gru, b_gru=b_gru,
        w1=pad_w(p['w1'].T, H_p, V_p).astype(bf16), b1=pad_b(p['b1'], V_p),
        p1w=pad_w(p['p1w'].T, H_p, H_p).astype(bf16), p1b=pad_b(p['p1b'], H_p),
        p2w=pad_w(p['p2w'].T, H_p, H_p).astype(bf16), p2b=pad_b(p['p2b'], H_p),
        p3w=pad_w(p['p3w'].T, H_p, H_p).astype(bf16), p3b=pad_b(p['p3b'], H_p),
        w_ms=w_ms, b_ms=b_ms)


def _prepare_inputs(raw, embed_z_dropped, last_hidden, u_enc_out, m_enc_out,
                    pv_pz_proba, pv_z_dec_out, rand_eps, u_ids_tb, m_ids_tb):
    f32, bf16 = jnp.float32, jnp.bfloat16
    B, E = rand_eps.shape
    H = last_hidden.shape[-1]
    V = pv_pz_proba.shape[-1]
    Tu, Tm, Tz = u_ids_tb.shape[0], m_ids_tb.shape[0], pv_z_dec_out.shape[0]
    B_BLK = _pick_batch_block(B)
    B_p = _round_up(B, B_BLK)
    E_p, H_p, V_p = _round_up(E, _LANE), _round_up(H, _LANE), _round_up(V, _LANE)
    Tu_p, Tm_p, Tz_p = _round_up(Tu, 8), _round_up(Tm, 8), _round_up(Tz, 8)

    kp = _prepare_padded_params(raw, E, H, V, E_p, H_p, V_p)

    # fused [x | h0] activation, so the in-kernel GRU is one MXU pass
    x_p = _pad2(embed_z_dropped[0].astype(f32), B_p, E_p)
    h0_p = _pad2(last_hidden[0].astype(f32), B_p, H_p)
    xh_p = jnp.concatenate([x_p, h0_p], axis=1)                       # (B_p, E_p + H_p)

    # encoder activations / pv proba kept in native (T, B, *) layout (no transposes)
    u_enc_p = _pad3(u_enc_out.astype(f32), Tu_p, B_p, H_p).astype(bf16)
    m_enc_p = _pad3(m_enc_out.astype(f32), Tm_p, B_p, H_p).astype(bf16)
    pvz_p = _pad3(pv_z_dec_out.astype(f32), Tz_p, B_p, H_p).astype(bf16)
    pvp_p = _pad3(_shift_pz(pv_pz_proba).astype(f32), Tz_p, B_p, V_p)  # f32 for log precision
    u_ids_p = _pad2(jnp.transpose(u_ids_tb).astype(jnp.int32), B_p, Tu_p)
    m_ids_p = _pad2(jnp.transpose(m_ids_tb).astype(jnp.int32), B_p, Tm_p)
    eps_p = _pad2(rand_eps.astype(f32), B_p, E_p)

    arrays = [
        xh_p, u_enc_p, m_enc_p, pvz_p, u_ids_p, m_ids_p, pvp_p, eps_p,
        kp['w_gru'], kp['b_gru'], kp['w1'], kp['b1'],
        kp['p1w'], kp['p1b'], kp['p2w'], kp['p2b'], kp['p3w'], kp['p3b'],
        kp['w_ms'], kp['b_ms'],
    ]
    dims = dict(B=B, E=E, H=H, V=V, Tu=Tu, Tm=Tm, Tz=Tz, B_BLK=B_BLK,
                B_p=B_p, E_p=E_p, H_p=H_p, V_p=V_p,
                Tu_p=Tu_p, Tm_p=Tm_p, Tz_p=Tz_p)
    return arrays, dims


def _decoder_z_pallas(raw_params, embed_z_dropped, last_hidden, u_enc_out, m_enc_out,
                      pv_pz_proba, pv_z_dec_out, rand_eps, u_ids_tb, m_ids_tb):
    arrays, d = _prepare_inputs(raw_params, embed_z_dropped, last_hidden, u_enc_out,
                                m_enc_out, pv_pz_proba, pv_z_dec_out, rand_eps,
                                u_ids_tb, m_ids_tb)
    B, E, H, V = d['B'], d['E'], d['H'], d['V']
    B_BLK, B_p = d['B_BLK'], d['B_p']
    E_p, H_p, V_p = d['E_p'], d['H_p'], d['V_p']

    in_specs = []
    for idx, a in enumerate(arrays):
        if idx < _N_ACT:                 # batch-major / batch-second activations
            if a.ndim == 2:              # (B_p, X): blocked over batch rows
                in_specs.append(pl.BlockSpec((B_BLK, a.shape[1]), lambda i: (i, 0)))
            else:                        # (T, B_p, X): blocked over the batch axis
                in_specs.append(pl.BlockSpec((a.shape[0], B_BLK, a.shape[2]),
                                             lambda i: (0, i, 0)))
        else:                            # weights / biases: full 2-D array every step
            # TODO(synk): on v7x single-buffer these constant blocks
            # (pipeline_mode=pl.Buffered(1)) to halve their VMEM footprint.
            in_specs.append(pl.BlockSpec(a.shape, lambda i: (0, 0)))

    bmap = lambda i: (i, 0)
    out_specs = (
        pl.BlockSpec((B_BLK, E_p), bmap),
        pl.BlockSpec((B_BLK, H_p), bmap),
        pl.BlockSpec((B_BLK, V_p), bmap),
        pl.BlockSpec((B_BLK, E_p), bmap),
        pl.BlockSpec((B_BLK, E_p), bmap),
    )
    out_shape = (
        jax.ShapeDtypeStruct((B_p, E_p), jnp.float32),   # sampled_ae
        jax.ShapeDtypeStruct((B_p, H_p), jnp.float32),   # gru_out / last_hidden
        jax.ShapeDtypeStruct((B_p, V_p), jnp.float32),   # proba
        jax.ShapeDtypeStruct((B_p, E_p), jnp.float32),   # appr_emb
        jax.ShapeDtypeStruct((B_p, E_p), jnp.float32),   # log_sigma_ae
    )
    kernel = _make_kernel(V, d['Tu'], d['Tm'], d['Tz'], E_p, H_p)
    samp, gru, proba, appr, ls = pl.pallas_call(
        kernel,
        grid=(B_p // B_BLK,),
        in_specs=in_specs,
        out_specs=out_specs,
        out_shape=out_shape,
        compiler_params=pltpu.CompilerParams(
            dimension_semantics=("parallel",),
            vmem_limit_bytes=32 * 1024 * 1024),
    )(*arrays)
    return samp[:B, :E], gru[:B, :H], proba[:B, :V], appr[:B, :E], ls[:B, :E]


def multi_turn_inference_decoder_z(raw_params, embed_z, last_hidden, u_enc_out,
                                   m_enc_out, pv_pz_proba, pv_z_dec_out,
                                   rand_eps, u_input_np, m_input_np,
                                   dropout_key, dropout_rate):
    """Mirrors MultiTurnInferenceDecoder_Z.forward (force_stable=True, pv branch on)."""
    # TODO(synk): if this decoder is stepped repeatedly, hoist the encoder-only
    # tanh projections (proj_copy1/2/3) out of the per-step kernel.
    embed_z_dropped = apply_dropout(embed_z, dropout_key, dropout_rate)
    sampled, h_new, proba, appr, log_sigma = _decoder_z_pallas(
        raw_params, embed_z_dropped, last_hidden, u_enc_out, m_enc_out,
        pv_pz_proba, pv_z_dec_out, rand_eps, u_input_np, m_input_np)
    gru_out = h_new[None, :, :]
    return sampled, gru_out, gru_out, proba, appr, log_sigma


# -----------------------------------------------------------------------------
# Plain-JAX, all-f32 replica of the original PyTorch math (loose fidelity check)
# -----------------------------------------------------------------------------
def reference_original(p, embed_z_dropped, last_hidden, u_enc_out, m_enc_out,
                       pv_pz_proba, pv_z_dec_out, rand_eps, u_ids_tb, m_ids_tb, V):
    x = embed_z_dropped[0]
    h = last_hidden[0]
    H = h.shape[1]
    gi = x @ p['w_ih'].T + p['b_ih']
    gh = h @ p['w_hh'].T + p['b_hh']
    r = jax.nn.sigmoid(gi[:, :H] + gh[:, :H])
    z = jax.nn.sigmoid(gi[:, H:2 * H] + gh[:, H:2 * H])
    n = jnp.tanh(gi[:, 2 * H:] + r * gh[:, 2 * H:])
    h_new = (1.0 - z) * n + z * h
    gen = h_new @ p['w1'].T + p['b1']

    def sparse(ids_tb):
        onehot = jax.nn.one_hot(ids_tb, V, dtype=jnp.float32)
        keep = jnp.logical_and((ids_tb != 0)[..., None], onehot > 0.5)
        return jnp.transpose(jnp.where(keep, 1.0, 1e-10), (1, 0, 2))

    def scores(enc_tb, w, b):
        enc = jnp.transpose(enc_tb, (1, 0, 2))
        proj = jnp.tanh(jnp.einsum('bth,kh->btk', enc, w) + b)
        return jnp.einsum('bth,bh->bt', proj, h_new)

    u_s = scores(u_enc_out, p['p1w'], p['p1b'])
    m_s = scores(m_enc_out, p['p2w'], p['p2b'])
    u_mx = jnp.max(u_s, axis=1, keepdims=True)
    m_mx = jnp.max(m_s, axis=1, keepdims=True)
    u_copy = jnp.log(jnp.einsum('bt,btv->bv', jnp.exp(u_s - u_mx), sparse(u_ids_tb))) + u_mx
    m_copy = jnp.log(jnp.einsum('bt,btv->bv', jnp.exp(m_s - m_mx), sparse(m_ids_tb))) + m_mx
    pvp = jnp.transpose(_shift_pz(pv_pz_proba), (1, 0, 2))
    pv_s = scores(pv_z_dec_out, p['p3w'], p['p3b'])
    pv_copy = jnp.log(jnp.einsum('bt,btv->bv', jnp.exp(pv_s), pvp))
    sc = jax.nn.softmax(jnp.concatenate([gen, u_copy, m_copy, pv_copy], axis=1), axis=1)
    proba = sc[:, :V] + sc[:, V:2 * V] + sc[:, 2 * V:3 * V] + sc[:, 3 * V:]
    appr = proba @ p['mu_w'].T + p['mu_b']
    log_sigma = proba @ p['ls_w'].T + p['ls_b']
    sampled = appr + jnp.exp(log_sigma) * rand_eps
    return sampled, h_new, proba, appr, log_sigma


if __name__ == "__main__":
    B, E, H, V = 4, 16, 32, 64
    Tu, Tm, Tz = 10, 12, 8
    dropout_rate = 0.1

    key = jax.random.PRNGKey(0)
    ks = jax.random.split(key, 12)
    raw = init_params(ks[0], E, H, V)

    embed_z = jax.random.normal(ks[1], (1, B, E), jnp.float32)
    last_hidden = jax.random.normal(ks[2], (1, B, H), jnp.float32)
    u_enc_out = jax.random.normal(ks[3], (Tu, B, H), jnp.float32)
    m_enc_out = jax.random.normal(ks[4], (Tm, B, H), jnp.float32)
    pv_z_dec_out = jax.random.normal(ks[5], (Tz, B, H), jnp.float32)
    pv_pz_proba = jax.nn.softmax(jax.random.normal(ks[6], (Tz, B, V), jnp.float32), axis=-1)
    rand_eps = jax.random.normal(ks[7], (B, E), jnp.float32)
    u_input_np = jax.random.randint(ks[8], (Tu, B), 0, V)
    m_input_np = jax.random.randint(ks[9], (Tm, B), 0, V)
    u_input_np = u_input_np.at[0, 0].set(0)   # exercise the ignore_index=0 path
    m_input_np = m_input_np.at[1, 1].set(0)
    dropout_key = ks[10]

    outs = multi_turn_inference_decoder_z(
        raw, embed_z, last_hidden, u_enc_out, m_enc_out, pv_pz_proba,
        pv_z_dec_out, rand_eps, u_input_np, m_input_np, dropout_key, dropout_rate)
    outs = jax.block_until_ready(outs)
    sampled_ae, gru_out, last_h, proba, appr_emb, log_sigma_ae = outs

    # --- parity check: Pallas lowering vs identical math lowered through XLA ---
    embed_z_dropped = apply_dropout(embed_z, dropout_key, dropout_rate)
    arrays, dims = _prepare_inputs(raw, embed_z_dropped, last_hidden, u_enc_out,
                                   m_enc_out, pv_pz_proba, pv_z_dec_out, rand_eps,
                                   u_input_np, m_input_np)
    ref = _decoder_forward_math(*arrays, V_real=V, Tu_real=Tu, Tm_real=Tm, Tz_real=Tz,
                                E_p=dims['E_p'], H_p=dims['H_p'], in_kernel=False)
    r_sampled = ref[0][:B, :E]; r_gru = ref[1][:B, :H]; r_proba = ref[2][:B, :V]
    r_appr = ref[3][:B, :E]; r_ls = ref[4][:B, :E]
    np.testing.assert_allclose(np.asarray(sampled_ae), np.asarray(r_sampled), rtol=1e-2, atol=5e-3)
    np.testing.assert_allclose(np.asarray(gru_out[0]), np.asarray(r_gru), rtol=1e-2, atol=5e-3)
    np.testing.assert_allclose(np.asarray(proba), np.asarray(r_proba), rtol=1e-2, atol=5e-3)
    np.testing.assert_allclose(np.asarray(appr_emb), np.asarray(r_appr), rtol=1e-2, atol=5e-3)
    np.testing.assert_allclose(np.asarray(log_sigma_ae), np.asarray(r_ls), rtol=1e-2, atol=5e-3)

    # --- loose fidelity check vs the original all-f32 math (bf16 matmul noise only) ---
    f_out = reference_original(raw, embed_z_dropped, last_hidden, u_enc_out, m_enc_out,
                               pv_pz_proba, pv_z_dec_out, rand_eps,
                               u_input_np, m_input_np, V)
    f_sampled, f_gru, f_proba, f_appr, f_ls = f_out
    np.testing.assert_allclose(np.asarray(proba), np.asarray(f_proba), rtol=0.3, atol=0.15)
    np.testing.assert_allclose(np.asarray(gru_out[0]), np.asarray(f_gru), rtol=0.3, atol=0.15)
    np.testing.assert_allclose(np.asarray(appr_emb), np.asarray(f_appr), rtol=0.3, atol=0.15)
    np.testing.assert_allclose(np.asarray(log_sigma_ae), np.asarray(f_ls), rtol=0.3, atol=0.15)
    np.testing.assert_allclose(np.asarray(sampled_ae), np.asarray(f_sampled), rtol=0.3, atol=0.15)

    assert bool(jnp.all(jnp.isfinite(sampled_ae)))
    print("KERNEL_OK")
</pallas_src>

<mosaic_0001>
module attributes {stable_mosaic.version = 11 : i64} {
  func.func @kernel(%arg0: i32, %arg1: memref<8x256xf32, #tpu.memory_space<vmem>>, %arg2: memref<16x8x128xbf16, #tpu.memory_space<vmem>>, %arg3: memref<16x8x128xbf16, #tpu.memory_space<vmem>>, %arg4: memref<8x8x128xbf16, #tpu.memory_space<vmem>>, %arg5: memref<8x16xi32, #tpu.memory_space<vmem>>, %arg6: memref<8x16xi32, #tpu.memory_space<vmem>>, %arg7: memref<8x8x128xf32, #tpu.memory_space<vmem>>, %arg8: memref<8x128xf32, #tpu.memory_space<vmem>>, %arg9: memref<256x512xbf16, #tpu.memory_space<vmem>>, %arg10: memref<1x512xf32, #tpu.memory_space<vmem>>, %arg11: memref<128x128xbf16, #tpu.memory_space<vmem>>, %arg12: memref<1x128xf32, #tpu.memory_space<vmem>>, %arg13: memref<128x128xbf16, #tpu.memory_space<vmem>>, %arg14: memref<1x128xf32, #tpu.memory_space<vmem>>, %arg15: memref<128x128xbf16, #tpu.memory_space<vmem>>, %arg16: memref<1x128xf32, #tpu.memory_space<vmem>>, %arg17: memref<128x128xbf16, #tpu.memory_space<vmem>>, %arg18: memref<1x128xf32, #tpu.memory_space<vmem>>, %arg19: memref<128x256xbf16, #tpu.memory_space<vmem>>, %arg20: memref<1x256xf32, #tpu.memory_space<vmem>>, %arg21: memref<8x128xf32, #tpu.memory_space<vmem>>, %arg22: memref<8x128xf32, #tpu.memory_space<vmem>>, %arg23: memref<8x128xf32, #tpu.memory_space<vmem>>, %arg24: memref<8x128xf32, #tpu.memory_space<vmem>>, %arg25: memref<8x128xf32, #tpu.memory_space<vmem>>) attributes {dimension_semantics = [#tpu.dimension_semantics<parallel>], iteration_bounds = array<i64: 1>, scalar_prefetch = 0 : i64, scratch_operands = 0 : i64, tpu.core_type = #tpu.core_type<tc>, window_params = [{transform_indices = @transform_0, window_bounds = array<i64: 8, 256>}, {transform_indices = @transform_1, window_bounds = array<i64: 16, 8, 128>}, {transform_indices = @transform_2, window_bounds = array<i64: 16, 8, 128>}, {transform_indices = @transform_3, window_bounds = array<i64: 8, 8, 128>}, {transform_indices = @transform_4, window_bounds = array<i64: 8, 16>}, {transform_indices = @transform_5, window_bounds = array<i64: 8, 16>}, {transform_indices = @transform_6, window_bounds = array<i64: 8, 8, 128>}, {transform_indices = @transform_7, window_bounds = array<i64: 8, 128>}, {pipeline_mode = #tpu.pipeline_mode<synchronous>, transform_indices = @transform_8, window_bounds = array<i64: 256, 512>}, {pipeline_mode = #tpu.pipeline_mode<synchronous>, transform_indices = @transform_9, window_bounds = array<i64: 1, 512>}, {pipeline_mode = #tpu.pipeline_mode<synchronous>, transform_indices = @transform_10, window_bounds = array<i64: 128, 128>}, {pipeline_mode = #tpu.pipeline_mode<synchronous>, transform_indices = @transform_11, window_bounds = array<i64: 1, 128>}, {pipeline_mode = #tpu.pipeline_mode<synchronous>, transform_indices = @transform_12, window_bounds = array<i64: 128, 128>}, {pipeline_mode = #tpu.pipeline_mode<synchronous>, transform_indices = @transform_13, window_bounds = array<i64: 1, 128>}, {pipeline_mode = #tpu.pipeline_mode<synchronous>, transform_indices = @transform_14, window_bounds = array<i64: 128, 128>}, {pipeline_mode = #tpu.pipeline_mode<synchronous>, transform_indices = @transform_15, window_bounds = array<i64: 1, 128>}, {pipeline_mode = #tpu.pipeline_mode<synchronous>, transform_indices = @transform_16, window_bounds = array<i64: 128, 128>}, {pipeline_mode = #tpu.pipeline_mode<synchronous>, transform_indices = @transform_17, window_bounds = array<i64: 1, 128>}, {pipeline_mode = #tpu.pipeline_mode<synchronous>, transform_indices = @transform_18, window_bounds = array<i64: 128, 256>}, {pipeline_mode = #tpu.pipeline_mode<synchronous>, transform_indices = @transform_19, window_bounds = array<i64: 1, 256>}, {transform_indices = @transform_20, window_bounds = array<i64: 8, 128>}, {transform_indices = @transform_21, window_bounds = array<i64: 8, 128>}, {transform_indices = @transform_22, window_bounds = array<i64: 8, 128>}, {transform_indices = @transform_23, window_bounds = array<i64: 8, 128>}, {transform_indices = @transform_24, window_bounds = array<i64: 8, 128>}]} {
    %c0 = arith.constant 0 : index
    %c0_0 = arith.constant 0 : index
    %0 = vector.load %arg1[%c0, %c0_0] : memref<8x256xf32, #tpu.memory_space<vmem>>, vector<8x256xf32>
    %c0_1 = arith.constant 0 : index
    %c0_2 = arith.constant 0 : index
    %c0_3 = arith.constant 0 : index
    %1 = vector.load %arg2[%c0_1, %c0_2, %c0_3] : memref<16x8x128xbf16, #tpu.memory_space<vmem>>, vector<16x8x128xbf16>
    %c0_4 = arith.constant 0 : index
    %c0_5 = arith.constant 0 : index
    %c0_6 = arith.constant 0 : index
    %2 = vector.load %arg3[%c0_4, %c0_5, %c0_6] : memref<16x8x128xbf16, #tpu.memory_space<vmem>>, vector<16x8x128xbf16>
    %c0_7 = arith.constant 0 : index
    %c0_8 = arith.constant 0 : index
    %c0_9 = arith.constant 0 : index
    %3 = vector.load %arg4[%c0_7, %c0_8, %c0_9] : memref<8x8x128xbf16, #tpu.memory_space<vmem>>, vector<8x8x128xbf16>
    %c0_10 = arith.constant 0 : index
    %c0_11 = arith.constant 0 : index
    %4 = vector.load %arg5[%c0_10, %c0_11] : memref<8x16xi32, #tpu.memory_space<vmem>>, vector<8x16xi32>
    %c0_12 = arith.constant 0 : index
    %c0_13 = arith.constant 0 : index
    %5 = vector.load %arg6[%c0_12, %c0_13] : memref<8x16xi32, #tpu.memory_space<vmem>>, vector<8x16xi32>
    %c0_14 = arith.constant 0 : index
    %c0_15 = arith.constant 0 : index
    %6 = vector.load %arg8[%c0_14, %c0_15] : memref<8x128xf32, #tpu.memory_space<vmem>>, vector<8x128xf32>
    %c0_16 = arith.constant 0 : index
    %c0_17 = arith.constant 0 : index
    %7 = vector.load %arg9[%c0_16, %c0_17] : memref<256x512xbf16, #tpu.memory_space<vmem>>, vector<256x512xbf16>
    %c0_18 = arith.constant 0 : index
    %c0_19 = arith.constant 0 : index
    %8 = vector.load %arg10[%c0_18, %c0_19] : memref<1x512xf32, #tpu.memory_space<vmem>>, vector<1x512xf32>
    %c0_20 = arith.constant 0 : index
    %c0_21 = arith.constant 0 : index
    %9 = vector.load %arg11[%c0_20, %c0_21] : memref<128x128xbf16, #tpu.memory_space<vmem>>, vector<128x128xbf16>
    %c0_22 = arith.constant 0 : index
    %c0_23 = arith.constant 0 : index
    %10 = vector.load %arg12[%c0_22, %c0_23] : memref<1x128xf32, #tpu.memory_space<vmem>>, vector<1x128xf32>
    %c0_24 = arith.constant 0 : index
    %c0_25 = arith.constant 0 : index
    %11 = vector.load %arg13[%c0_24, %c0_25] : memref<128x128xbf16, #tpu.memory_space<vmem>>, vector<128x128xbf16>
    %c0_26 = arith.constant 0 : index
    %c0_27 = arith.constant 0 : index
    %12 = vector.load %arg14[%c0_26, %c0_27] : memref<1x128xf32, #tpu.memory_space<vmem>>, vector<1x128xf32>
    %c0_28 = arith.constant 0 : index
    %c0_29 = arith.constant 0 : index
    %13 = vector.load %arg15[%c0_28, %c0_29] : memref<128x128xbf16, #tpu.memory_space<vmem>>, vector<128x128xbf16>
    %c0_30 = arith.constant 0 : index
    %c0_31 = arith.constant 0 : index
    %14 = vector.load %arg16[%c0_30, %c0_31] : memref<1x128xf32, #tpu.memory_space<vmem>>, vector<1x128xf32>
    %c0_32 = arith.constant 0 : index
    %c0_33 = arith.constant 0 : index
    %15 = vector.load %arg17[%c0_32, %c0_33] : memref<128x128xbf16, #tpu.memory_space<vmem>>, vector<128x128xbf16>
    %c0_34 = arith.constant 0 : index
    %c0_35 = arith.constant 0 : index
    %16 = vector.load %arg18[%c0_34, %c0_35] : memref<1x128xf32, #tpu.memory_space<vmem>>, vector<1x128xf32>
    %c0_36 = arith.constant 0 : index
    %c0_37 = arith.constant 0 : index
    %17 = vector.load %arg19[%c0_36, %c0_37] : memref<128x256xbf16, #tpu.memory_space<vmem>>, vector<128x256xbf16>
    %c0_38 = arith.constant 0 : index
    %c0_39 = arith.constant 0 : index
    %18 = vector.load %arg20[%c0_38, %c0_39] : memref<1x256xf32, #tpu.memory_space<vmem>>, vector<1x256xf32>
    %19 = vector.extract_strided_slice %0 {offsets = [0, 128], sizes = [8, 128], strides = [1, 1]} : vector<8x256xf32> to vector<8x128xf32>
    %20 = arith.truncf %0 : vector<8x256xf32> to vector<8x256xbf16>
    %cst = arith.constant dense<0.000000e+00> : vector<8x512xf32>
    %21 = tpu.matmul %20, %7, %cst {dimension_numbers = #tpu.dot_dimension_numbers<[1], [0], [0], [1], [0, 0, 1, 1], [], []>} : vector<8x256xbf16>, vector<256x512xbf16>, vector<8x512xf32> -> vector<8x512xf32>
    %22 = vector.broadcast %8 : vector<1x512xf32> to vector<8x512xf32>
    %23 = arith.addf %21, %22 : vector<8x512xf32>
    %24 = vector.extract_strided_slice %23 {offsets = [0, 0], sizes = [8, 128], strides = [1, 1]} : vector<8x512xf32> to vector<8x128xf32>
    %25 = arith.negf %24 : vector<8x128xf32>
    %26 = math.exp %25 : vector<8x128xf32>
    %cst_40 = arith.constant 1.000000e+00 : f32
    %27 = vector.broadcast %cst_40 : f32 to vector<8x128xf32>
    %28 = arith.addf %27, %26 : vector<8x128xf32>
    %29 = arith.divf %27, %28 : vector<8x128xf32>
    %30 = vector.extract_strided_slice %23 {offsets = [0, 128], sizes = [8, 128], strides = [1, 1]} : vector<8x512xf32> to vector<8x128xf32>
    %31 = arith.negf %30 : vector<8x128xf32>
    %32 = math.exp %31 : vector<8x128xf32>
    %cst_41 = arith.constant 1.000000e+00 : f32
    %33 = vector.broadcast %cst_41 : f32 to vector<8x128xf32>
    %34 = arith.addf %33, %32 : vector<8x128xf32>
    %35 = arith.divf %33, %34 : vector<8x128xf32>
    %36 = vector.extract_strided_slice %23 {offsets = [0, 256], sizes = [8, 128], strides = [1, 1]} : vector<8x512xf32> to vector<8x128xf32>
    %37 = vector.extract_strided_slice %23 {offsets = [0, 384], sizes = [8, 128], strides = [1, 1]} : vector<8x512xf32> to vector<8x128xf32>
    %38 = arith.mulf %29, %37 : vector<8x128xf32>
    %39 = arith.addf %36, %38 : vector<8x128xf32>
    %40 = math.tanh %39 : vector<8x128xf32>
    %cst_42 = arith.constant 1.000000e+00 : f32
    %41 = vector.broadcast %cst_42 : f32 to vector<8x128xf32>
    %42 = arith.subf %41, %35 : vector<8x128xf32>
    %43 = arith.mulf %42, %40 : vector<8x128xf32>
    %44 = arith.mulf %35, %19 : vector<8x128xf32>
    %45 = arith.addf %43, %44 : vector<8x128xf32>
    %46 = arith.truncf %45 : vector<8x128xf32> to vector<8x128xbf16>
    %47 = tpu.iota {dimensions = array<i32: 1>} : vector<8x128xi32>
    %c64_i32 = arith.constant 64 : i32
    %48 = vector.broadcast %c64_i32 : i32 to vector<8x128xi32>
    %49 = arith.cmpi slt, %47, %48 : vector<8x128xi32>
    %50 = arith.sitofp %47 : vector<8x128xi32> to vector<8x128xf32>
    %cst_43 = arith.constant dense<0.000000e+00> : vector<8x128xf32>
    %51 = tpu.matmul %46, %9, %cst_43 {dimension_numbers = #tpu.dot_dimension_numbers<[1], [0], [0], [1], [0, 0, 1, 1], [], []>} : vector<8x128xbf16>, vector<128x128xbf16>, vector<8x128xf32> -> vector<8x128xf32>
    %52 = vector.broadcast %10 : vector<1x128xf32> to vector<8x128xf32>
    %53 = arith.addf %51, %52 : vector<8x128xf32>
    %cst_44 = arith.constant -1.000000e+30 : f32
    %54 = vector.broadcast %cst_44 : f32 to vector<8x128xf32>
    %55 = arith.select %49, %53, %54 : vector<8x128xi1>, vector<8x128xf32>
    %56 = vector.shape_cast %1 : vector<16x8x128xbf16> to vector<128x128xbf16>
    %cst_45 = arith.constant dense<0.000000e+00> : vector<128x128xf32>
    %57 = tpu.matmul %56, %11, %cst_45 {dimension_numbers = #tpu.dot_dimension_numbers<[1], [0], [0], [1], [0, 0, 1, 1], [], []>} : vector<128x128xbf16>, vector<128x128xbf16>, vector<128x128xf32> -> vector<128x128xf32>
    %58 = vector.broadcast %12 : vector<1x128xf32> to vector<128x128xf32>
    %59 = arith.addf %57, %58 : vector<128x128xf32>
    %60 = math.tanh %59 : vector<128x128xf32>
    %61 = vector.shape_cast %60 : vector<128x128xf32> to vector<16x8x128xf32>
    %62 = vector.shape_cast %45 : vector<8x128xf32> to vector<1x8x128xf32>
    %63 = vector.broadcast %62 : vector<1x8x128xf32> to vector<16x8x128xf32>
    %64 = arith.mulf %61, %63 : vector<16x8x128xf32>
    %cst_46 = arith.constant dense<0.000000e+00> : vector<16x8xf32>
    %65 = vector.multi_reduction <add>, %64, %cst_46 [2] : vector<16x8x128xf32> to vector<16x8xf32>
    %66 = tpu.transpose %65, [1, 0] : vector<16x8xf32> -> vector<8x16xf32>
    %67 = tpu.iota {dimensions = array<i32: 1>} : vector<8x16xi32>
    %c10_i32 = arith.constant 10 : i32
    %68 = vector.broadcast %c10_i32 : i32 to vector<8x16xi32>
    %69 = arith.cmpi slt, %67, %68 : vector<8x16xi32>
    %cst_47 = arith.constant -1.000000e+30 : f32
    %70 = vector.broadcast %cst_47 : f32 to vector<8x16xf32>
    %71 = arith.select %69, %66, %70 : vector<8x16xi1>, vector<8x16xf32>
    %cst_48 = arith.constant dense<0xFF800000> : vector<8xf32>
    %72 = vector.multi_reduction <maximumf>, %71, %cst_48 [1] : vector<8x16xf32> to vector<8xf32>
    %73 = vector.shape_cast %72 : vector<8xf32> to vector<8x1xf32>
    %74 = vector.broadcast %73 : vector<8x1xf32> to vector<8x16xf32>
    %75 = arith.subf %71, %74 : vector<8x16xf32>
    %76 = math.exp %75 : vector<8x16xf32>
    %cst_49 = arith.constant dense<0.000000e+00> : vector<8xf32>
    %77 = vector.multi_reduction <add>, %76, %cst_49 [1] : vector<8x16xf32> to vector<8xf32>
    %78 = vector.shape_cast %77 : vector<8xf32> to vector<8x1xf32>
    %79 = arith.sitofp %4 : vector<8x16xi32> to vector<8x16xf32>
    %cst_50 = arith.constant 0.000000e+00 : f32
    %80 = vector.broadcast %cst_50 : f32 to vector<8x128xf32>
    %c0_i32 = arith.constant 0 : i32
    %c16_i32 = arith.constant 16 : i32
    %81 = arith.addi %c0_i32, %c16_i32 : i32
    %c1_i32 = arith.constant 1 : i32
    %82 = scf.for %arg26 = %c0_i32 to %81 step %c1_i32 iter_args(%arg27 = %80) -> (vector<8x128xf32>)  : i32 {
      %194 = vector.broadcast %arg26 : i32 to vector<8x16xi32>
      %195 = arith.cmpi eq, %67, %194 : vector<8x16xi32>
      %cst_90 = arith.constant 0.000000e+00 : f32
      %196 = vector.broadcast %cst_90 : f32 to vector<8x16xf32>
      %197 = arith.select %195, %76, %196 : vector<8x16xi1>, vector<8x16xf32>
      %cst_91 = arith.constant dense<0.000000e+00> : vector<8xf32>
      %198 = vector.multi_reduction <add>, %197, %cst_91 [1] : vector<8x16xf32> to vector<8xf32>
      %199 = vector.shape_cast %198 : vector<8xf32> to vector<8x1xf32>
      %cst_92 = arith.constant 0.000000e+00 : f32
      %200 = vector.broadcast %cst_92 : f32 to vector<8x16xf32>
      %201 = arith.select %195, %79, %200 : vector<8x16xi1>, vector<8x16xf32>
      %cst_93 = arith.constant dense<0.000000e+00> : vector<8xf32>
      %202 = vector.multi_reduction <add>, %201, %cst_93 [1] : vector<8x16xf32> to vector<8xf32>
      %203 = vector.shape_cast %202 : vector<8xf32> to vector<8x1xf32>
      %204 = vector.broadcast %203 : vector<8x1xf32> to vector<8x128xf32>
      %205 = arith.cmpf oeq, %50, %204 : vector<8x128xf32>
      %cst_94 = arith.constant 0.000000e+00 : f32
      %206 = vector.broadcast %cst_94 : f32 to vector<8x1xf32>
      %207 = arith.cmpf ogt, %203, %206 : vector<8x1xf32>
      %208 = vector.broadcast %207 : vector<8x1xi1> to vector<8x128xi1>
      %209 = arith.andi %205, %208 : vector<8x128xi1>
      %cst_95 = arith.constant 0.000000e+00 : f32
      %210 = vector.shape_cast %199 : vector<8x1xf32> to vector<8x1xf32>
      %211 = vector.broadcast %210 : vector<8x1xf32> to vector<8x128xf32>
      %212 = vector.broadcast %cst_95 : f32 to vector<8x128xf32>
      %213 = arith.select %209, %211, %212 : vector<8x128xi1>, vector<8x128xf32>
      %214 = arith.addf %arg27, %213 : vector<8x128xf32>
      scf.yield %214 : vector<8x128xf32>
    }
    %c16_i32_51 = arith.constant 16 : i32
    %cst_52 = arith.constant 1.000000e+00 : f32
    %83 = vector.broadcast %cst_52 : f32 to vector<8x128xf32>
    %84 = arith.mulf %82, %83 : vector<8x128xf32>
    %cst_53 = arith.constant 1.000000e-10 : f32
    %85 = vector.broadcast %cst_53 : f32 to vector<8x1xf32>
    %86 = arith.mulf %85, %78 : vector<8x1xf32>
    %87 = vector.broadcast %86 : vector<8x1xf32> to vector<8x128xf32>
    %88 = arith.addf %84, %87 : vector<8x128xf32>
    %89 = math.log %88 : vector<8x128xf32>
    %90 = vector.broadcast %73 : vector<8x1xf32> to vector<8x128xf32>
    %91 = arith.addf %89, %90 : vector<8x128xf32>
    %cst_54 = arith.constant -1.000000e+30 : f32
    %92 = vector.broadcast %cst_54 : f32 to vector<8x128xf32>
    %93 = arith.select %49, %91, %92 : vector<8x128xi1>, vector<8x128xf32>
    %94 = vector.shape_cast %2 : vector<16x8x128xbf16> to vector<128x128xbf16>
    %cst_55 = arith.constant dense<0.000000e+00> : vector<128x128xf32>
    %95 = tpu.matmul %94, %13, %cst_55 {dimension_numbers = #tpu.dot_dimension_numbers<[1], [0], [0], [1], [0, 0, 1, 1], [], []>} : vector<128x128xbf16>, vector<128x128xbf16>, vector<128x128xf32> -> vector<128x128xf32>
    %96 = vector.broadcast %14 : vector<1x128xf32> to vector<128x128xf32>
    %97 = arith.addf %95, %96 : vector<128x128xf32>
    %98 = math.tanh %97 : vector<128x128xf32>
    %99 = vector.shape_cast %98 : vector<128x128xf32> to vector<16x8x128xf32>
    %100 = vector.shape_cast %45 : vector<8x128xf32> to vector<1x8x128xf32>
    %101 = vector.broadcast %100 : vector<1x8x128xf32> to vector<16x8x128xf32>
    %102 = arith.mulf %99, %101 : vector<16x8x128xf32>
    %cst_56 = arith.constant dense<0.000000e+00> : vector<16x8xf32>
    %103 = vector.multi_reduction <add>, %102, %cst_56 [2] : vector<16x8x128xf32> to vector<16x8xf32>
    %104 = tpu.transpose %103, [1, 0] : vector<16x8xf32> -> vector<8x16xf32>
    %105 = tpu.iota {dimensions = array<i32: 1>} : vector<8x16xi32>
    %c12_i32 = arith.constant 12 : i32
    %106 = vector.broadcast %c12_i32 : i32 to vector<8x16xi32>
    %107 = arith.cmpi slt, %105, %106 : vector<8x16xi32>
    %cst_57 = arith.constant -1.000000e+30 : f32
    %108 = vector.broadcast %cst_57 : f32 to vector<8x16xf32>
    %109 = arith.select %107, %104, %108 : vector<8x16xi1>, vector<8x16xf32>
    %cst_58 = arith.constant dense<0xFF800000> : vector<8xf32>
    %110 = vector.multi_reduction <maximumf>, %109, %cst_58 [1] : vector<8x16xf32> to vector<8xf32>
    %111 = vector.shape_cast %110 : vector<8xf32> to vector<8x1xf32>
    %112 = vector.broadcast %111 : vector<8x1xf32> to vector<8x16xf32>
    %113 = arith.subf %109, %112 : vector<8x16xf32>
    %114 = math.exp %113 : vector<8x16xf32>
    %cst_59 = arith.constant dense<0.000000e+00> : vector<8xf32>
    %115 = vector.multi_reduction <add>, %114, %cst_59 [1] : vector<8x16xf32> to vector<8xf32>
    %116 = vector.shape_cast %115 : vector<8xf32> to vector<8x1xf32>
    %117 = arith.sitofp %5 : vector<8x16xi32> to vector<8x16xf32>
    %cst_60 = arith.constant 0.000000e+00 : f32
    %118 = vector.broadcast %cst_60 : f32 to vector<8x128xf32>
    %c0_i32_61 = arith.constant 0 : i32
    %c16_i32_62 = arith.constant 16 : i32
    %119 = arith.addi %c0_i32_61, %c16_i32_62 : i32
    %c1_i32_63 = arith.constant 1 : i32
    %120 = scf.for %arg26 = %c0_i32_61 to %119 step %c1_i32_63 iter_args(%arg27 = %118) -> (vector<8x128xf32>)  : i32 {
      %194 = vector.broadcast %arg26 : i32 to vector<8x16xi32>
      %195 = arith.cmpi eq, %105, %194 : vector<8x16xi32>
      %cst_90 = arith.constant 0.000000e+00 : f32
      %196 = vector.broadcast %cst_90 : f32 to vector<8x16xf32>
      %197 = arith.select %195, %114, %196 : vector<8x16xi1>, vector<8x16xf32>
      %cst_91 = arith.constant dense<0.000000e+00> : vector<8xf32>
      %198 = vector.multi_reduction <add>, %197, %cst_91 [1] : vector<8x16xf32> to vector<8xf32>
      %199 = vector.shape_cast %198 : vector<8xf32> to vector<8x1xf32>
      %cst_92 = arith.constant 0.000000e+00 : f32
      %200 = vector.broadcast %cst_92 : f32 to vector<8x16xf32>
      %201 = arith.select %195, %117, %200 : vector<8x16xi1>, vector<8x16xf32>
      %cst_93 = arith.constant dense<0.000000e+00> : vector<8xf32>
      %202 = vector.multi_reduction <add>, %201, %cst_93 [1] : vector<8x16xf32> to vector<8xf32>
      %203 = vector.shape_cast %202 : vector<8xf32> to vector<8x1xf32>
      %204 = vector.broadcast %203 : vector<8x1xf32> to vector<8x128xf32>
      %205 = arith.cmpf oeq, %50, %204 : vector<8x128xf32>
      %cst_94 = arith.constant 0.000000e+00 : f32
      %206 = vector.broadcast %cst_94 : f32 to vector<8x1xf32>
      %207 = arith.cmpf ogt, %203, %206 : vector<8x1xf32>
      %208 = vector.broadcast %207 : vector<8x1xi1> to vector<8x128xi1>
      %209 = arith.andi %205, %208 : vector<8x128xi1>
      %cst_95 = arith.constant 0.000000e+00 : f32
      %210 = vector.shape_cast %199 : vector<8x1xf32> to vector<8x1xf32>
      %211 = vector.broadcast %210 : vector<8x1xf32> to vector<8x128xf32>
      %212 = vector.broadcast %cst_95 : f32 to vector<8x128xf32>
      %213 = arith.select %209, %211, %212 : vector<8x128xi1>, vector<8x128xf32>
      %214 = arith.addf %arg27, %213 : vector<8x128xf32>
      scf.yield %214 : vector<8x128xf32>
    }
    %c16_i32_64 = arith.constant 16 : i32
    %cst_65 = arith.constant 1.000000e+00 : f32
    %121 = vector.broadcast %cst_65 : f32 to vector<8x128xf32>
    %122 = arith.mulf %120, %121 : vector<8x128xf32>
    %cst_66 = arith.constant 1.000000e-10 : f32
    %123 = vector.broadcast %cst_66 : f32 to vector<8x1xf32>
    %124 = arith.mulf %123, %116 : vector<8x1xf32>
    %125 = vector.broadcast %124 : vector<8x1xf32> to vector<8x128xf32>
    %126 = arith.addf %122, %125 : vector<8x128xf32>
    %127 = math.log %126 : vector<8x128xf32>
    %128 = vector.broadcast %111 : vector<8x1xf32> to vector<8x128xf32>
    %129 = arith.addf %127, %128 : vector<8x128xf32>
    %cst_67 = arith.constant -1.000000e+30 : f32
    %130 = vector.broadcast %cst_67 : f32 to vector<8x128xf32>
    %131 = arith.select %49, %129, %130 : vector<8x128xi1>, vector<8x128xf32>
    %132 = vector.shape_cast %3 : vector<8x8x128xbf16> to vector<64x128xbf16>
    %cst_68 = arith.constant dense<0.000000e+00> : vector<64x128xf32>
    %133 = tpu.matmul %132, %15, %cst_68 {dimension_numbers = #tpu.dot_dimension_numbers<[1], [0], [0], [1], [0, 0, 1, 1], [], []>} : vector<64x128xbf16>, vector<128x128xbf16>, vector<64x128xf32> -> vector<64x128xf32>
    %134 = vector.broadcast %16 : vector<1x128xf32> to vector<64x128xf32>
    %135 = arith.addf %133, %134 : vector<64x128xf32>
    %136 = math.tanh %135 : vector<64x128xf32>
    %137 = vector.shape_cast %136 : vector<64x128xf32> to vector<8x8x128xf32>
    %138 = vector.shape_cast %45 : vector<8x128xf32> to vector<1x8x128xf32>
    %139 = vector.broadcast %138 : vector<1x8x128xf32> to vector<8x8x128xf32>
    %140 = arith.mulf %137, %139 : vector<8x8x128xf32>
    %cst_69 = arith.constant dense<0.000000e+00> : vector<8x8xf32>
    %141 = vector.multi_reduction <add>, %140, %cst_69 [2] : vector<8x8x128xf32> to vector<8x8xf32>
    %142 = tpu.transpose %141, [1, 0] : vector<8x8xf32> -> vector<8x8xf32>
    %143 = tpu.iota {dimensions = array<i32: 1>} : vector<8x8xi32>
    %c8_i32 = arith.constant 8 : i32
    %144 = vector.broadcast %c8_i32 : i32 to vector<8x8xi32>
    %145 = arith.cmpi slt, %143, %144 : vector<8x8xi32>
    %cst_70 = arith.constant -1.000000e+30 : f32
    %146 = vector.broadcast %cst_70 : f32 to vector<8x8xf32>
    %147 = arith.select %145, %142, %146 : vector<8x8xi1>, vector<8x8xf32>
    %148 = math.exp %147 : vector<8x8xf32>
    %cst_71 = arith.constant 0.000000e+00 : f32
    %149 = vector.broadcast %cst_71 : f32 to vector<8x128xf32>
    %c0_i32_72 = arith.constant 0 : i32
    %c8_i32_73 = arith.constant 8 : i32
    %150 = arith.addi %c0_i32_72, %c8_i32_73 : i32
    %c1_i32_74 = arith.constant 1 : i32
    %151 = scf.for %arg26 = %c0_i32_72 to %150 step %c1_i32_74 iter_args(%arg27 = %149) -> (vector<8x128xf32>)  : i32 {
      %194 = vector.broadcast %arg26 : i32 to vector<8x8xi32>
      %195 = arith.cmpi eq, %143, %194 : vector<8x8xi32>
      %cst_90 = arith.constant 0.000000e+00 : f32
      %196 = vector.broadcast %cst_90 : f32 to vector<8x8xf32>
      %197 = arith.select %195, %148, %196 : vector<8x8xi1>, vector<8x8xf32>
      %cst_91 = arith.constant dense<0.000000e+00> : vector<8xf32>
      %198 = vector.multi_reduction <add>, %197, %cst_91 [1] : vector<8x8xf32> to vector<8xf32>
      %199 = vector.shape_cast %198 : vector<8xf32> to vector<8x1xf32>
      %200 = arith.index_cast %arg26 : i32 to index
      %c0_92 = arith.constant 0 : index
      %c0_93 = arith.constant 0 : index
      %201 = vector.load %arg7[%200, %c0_92, %c0_93] : memref<8x8x128xf32, #tpu.memory_space<vmem>>, vector<1x8x128xf32>
      %202 = vector.shape_cast %201 : vector<1x8x128xf32> to vector<8x128xf32>
      %203 = vector.broadcast %199 : vector<8x1xf32> to vector<8x128xf32>
      %204 = arith.mulf %203, %202 : vector<8x128xf32>
      %205 = arith.addf %arg27, %204 : vector<8x128xf32>
      scf.yield %205 : vector<8x128xf32>
    }
    %c8_i32_75 = arith.constant 8 : i32
    %152 = math.log %151 : vector<8x128xf32>
    %cst_76 = arith.constant -1.000000e+30 : f32
    %153 = vector.broadcast %cst_76 : f32 to vector<8x128xf32>
    %154 = arith.select %49, %152, %153 : vector<8x128xi1>, vector<8x128xf32>
    %155 = arith.maximumf %55, %93 : vector<8x128xf32>
    %156 = arith.maximumf %131, %154 : vector<8x128xf32>
    %157 = arith.maximumf %155, %156 : vector<8x128xf32>
    %cst_77 = arith.constant dense<0xFF800000> : vector<8xf32>
    %158 = vector.multi_reduction <maximumf>, %157, %cst_77 [1] : vector<8x128xf32> to vector<8xf32>
    %159 = vector.shape_cast %158 : vector<8xf32> to vector<8x1xf32>
    %160 = vector.broadcast %159 : vector<8x1xf32> to vector<8x128xf32>
    %161 = arith.subf %55, %160 : vector<8x128xf32>
    %162 = math.exp %161 : vector<8x128xf32>
    %163 = vector.broadcast %159 : vector<8x1xf32> to vector<8x128xf32>
    %164 = arith.subf %93, %163 : vector<8x128xf32>
    %165 = math.exp %164 : vector<8x128xf32>
    %166 = arith.addf %162, %165 : vector<8x128xf32>
    %167 = vector.broadcast %159 : vector<8x1xf32> to vector<8x128xf32>
    %168 = arith.subf %131, %167 : vector<8x128xf32>
    %169 = math.exp %168 : vector<8x128xf32>
    %170 = arith.addf %166, %169 : vector<8x128xf32>
    %171 = vector.broadcast %159 : vector<8x1xf32> to vector<8x128xf32>
    %172 = arith.subf %154, %171 : vector<8x128xf32>
    %173 = math.exp %172 : vector<8x128xf32>
    %174 = arith.addf %170, %173 : vector<8x128xf32>
    %cst_78 = arith.constant dense<0.000000e+00> : vector<8xf32>
    %175 = vector.multi_reduction <add>, %174, %cst_78 [1] : vector<8x128xf32> to vector<8xf32>
    %176 = vector.shape_cast %175 : vector<8xf32> to vector<8x1xf32>
    %177 = tpu.reciprocal %176 {approx = true} : vector<8x1xf32> -> vector<8x1xf32>
    %178 = vector.broadcast %177 : vector<8x1xf32> to vector<8x128xf32>
    %179 = arith.mulf %174, %178 : vector<8x128xf32>
    %180 = arith.truncf %179 : vector<8x128xf32> to vector<8x128xbf16>
    %cst_79 = arith.constant dense<0.000000e+00> : vector<8x256xf32>
    %181 = tpu.matmul %180, %17, %cst_79 {dimension_numbers = #tpu.dot_dimension_numbers<[1], [0], [0], [1], [0, 0, 1, 1], [], []>} : vector<8x128xbf16>, vector<128x256xbf16>, vector<8x256xf32> -> vector<8x256xf32>
    %182 = vector.broadcast %18 : vector<1x256xf32> to vector<8x256xf32>
    %183 = arith.addf %181, %182 : vector<8x256xf32>
    %184 = vector.extract_strided_slice %183 {offsets = [0, 0], sizes = [8, 128], strides = [1, 1]} : vector<8x256xf32> to vector<8x128xf32>
    %185 = vector.extract_strided_slice %183 {offsets = [0, 128], sizes = [8, 128], strides = [1, 1]} : vector<8x256xf32> to vector<8x128xf32>
    %186 = math.exp %185 : vector<8x128xf32>
    %187 = arith.mulf %186, %6 : vector<8x128xf32>
    %188 = arith.addf %184, %187 : vector<8x128xf32>
    %c0_80 = arith.constant 0 : index
    %c0_81 = arith.constant 0 : index
    %189 = vector.load %arg21[%c0_80, %c0_81] : memref<8x128xf32, #tpu.memory_space<vmem>>, vector<8x128xf32>
    tpu.vector_store %arg21[%c0_80, %c0_81], %188 {strides = array<i32>} : memref<8x128xf32, #tpu.memory_space<vmem>>, vector<8x128xf32>,
    %c0_82 = arith.constant 0 : index
    %c0_83 = arith.constant 0 : index
    %190 = vector.load %arg22[%c0_82, %c0_83] : memref<8x128xf32, #tpu.memory_space<vmem>>, vector<8x128xf32>
    tpu.vector_store %arg22[%c0_82, %c0_83], %45 {strides = array<i32>} : memref<8x128xf32, #tpu.memory_space<vmem>>, vector<8x128xf32>,
    %c0_84 = arith.constant 0 : index
    %c0_85 = arith.constant 0 : index
    %191 = vector.load %arg23[%c0_84, %c0_85] : memref<8x128xf32, #tpu.memory_space<vmem>>, vector<8x128xf32>
    tpu.vector_store %arg23[%c0_84, %c0_85], %179 {strides = array<i32>} : memref<8x128xf32, #tpu.memory_space<vmem>>, vector<8x128xf32>,
    %c0_86 = arith.constant 0 : index
    %c0_87 = arith.constant 0 : index
    %192 = vector.load %arg24[%c0_86, %c0_87] : memref<8x128xf32, #tpu.memory_space<vmem>>, vector<8x128xf32>
    tpu.vector_store %arg24[%c0_86, %c0_87], %184 {strides = array<i32>} : memref<8x128xf32, #tpu.memory_space<vmem>>, vector<8x128xf32>,
    %c0_88 = arith.constant 0 : index
    %c0_89 = arith.constant 0 : index
    %193 = vector.load %arg25[%c0_88, %c0_89] : memref<8x128xf32, #tpu.memory_space<vmem>>, vector<8x128xf32>
    tpu.vector_store %arg25[%c0_88, %c0_89], %185 {strides = array<i32>} : memref<8x128xf32, #tpu.memory_space<vmem>>, vector<8x128xf32>,
    return
  }
  func.func @transform_0(%arg0: i32) -> (i32, i32) {
    %c0_i32 = arith.constant 0 : i32
    %c0_i32_0 = arith.constant 0 : i32
    return %arg0, %c0_i32 : i32, i32
  }
  func.func @transform_1(%arg0: i32) -> (i32, i32, i32) {
    %c0_i32 = arith.constant 0 : i32
    %c0_i32_0 = arith.constant 0 : i32
    %c0_i32_1 = arith.constant 0 : i32
    return %c0_i32, %arg0, %c0_i32_0 : i32, i32, i32
  }
  func.func @transform_2(%arg0: i32) -> (i32, i32, i32) {
    %c0_i32 = arith.constant 0 : i32
    %c0_i32_0 = arith.constant 0 : i32
    %c0_i32_1 = arith.constant 0 : i32
    return %c0_i32, %arg0, %c0_i32_0 : i32, i32, i32
  }
  func.func @transform_3(%arg0: i32) -> (i32, i32, i32) {
    %c0_i32 = arith.constant 0 : i32
    %c0_i32_0 = arith.constant 0 : i32
    %c0_i32_1 = arith.constant 0 : i32
    return %c0_i32, %arg0, %c0_i32_0 : i32, i32, i32
  }
  func.func @transform_4(%arg0: i32) -> (i32, i32) {
    %c0_i32 = arith.constant 0 : i32
    %c0_i32_0 = arith.constant 0 : i32
    return %arg0, %c0_i32 : i32, i32
  }
  func.func @transform_5(%arg0: i32) -> (i32, i32) {
    %c0_i32 = arith.constant 0 : i32
    %c0_i32_0 = arith.constant 0 : i32
    return %arg0, %c0_i32 : i32, i32
  }
  func.func @transform_6(%arg0: i32) -> (i32, i32, i32) {
    %c0_i32 = arith.constant 0 : i32
    %c0_i32_0 = arith.constant 0 : i32
    %c0_i32_1 = arith.constant 0 : i32
    return %c0_i32, %arg0, %c0_i32_0 : i32, i32, i32
  }
  func.func @transform_7(%arg0: i32) -> (i32, i32) {
    %c0_i32 = arith.constant 0 : i32
    %c0_i32_0 = arith.constant 0 : i32
    return %arg0, %c0_i32 : i32, i32
  }
  func.func @transform_8(%arg0: i32) -> (i32, i32) {
    %c0_i32 = arith.constant 0 : i32
    %c0_i32_0 = arith.constant 0 : i32
    %c0_i32_1 = arith.constant 0 : i32
    return %c0_i32, %c0_i32_0 : i32, i32
  }
  func.func @transform_9(%arg0: i32) -> (i32, i32) {
    %c0_i32 = arith.constant 0 : i32
    %c0_i32_0 = arith.constant 0 : i32
    %c0_i32_1 = arith.constant 0 : i32
    return %c0_i32, %c0_i32_0 : i32, i32
  }
  func.func @transform_10(%arg0: i32) -> (i32, i32) {
    %c0_i32 = arith.constant 0 : i32
    %c0_i32_0 = arith.constant 0 : i32
    %c0_i32_1 = arith.constant 0 : i32
    return %c0_i32, %c0_i32_0 : i32, i32
  }
  func.func @transform_11(%arg0: i32) -> (i32, i32) {
    %c0_i32 = arith.constant 0 : i32
    %c0_i32_0 = arith.constant 0 : i32
    %c0_i32_1 = arith.constant 0 : i32
    return %c0_i32, %c0_i32_0 : i32, i32
  }
  func.func @transform_12(%arg0: i32) -> (i32, i32) {
    %c0_i32 = arith.constant 0 : i32
    %c0_i32_0 = arith.constant 0 : i32
    %c0_i32_1 = arith.constant 0 : i32
    return %c0_i32, %c0_i32_0 : i32, i32
  }
  func.func @transform_13(%arg0: i32) -> (i32, i32) {
    %c0_i32 = arith.constant 0 : i32
    %c0_i32_0 = arith.constant 0 : i32
    %c0_i32_1 = arith.constant 0 : i32
    return %c0_i32, %c0_i32_0 : i32, i32
  }
  func.func @transform_14(%arg0: i32) -> (i32, i32) {
    %c0_i32 = arith.constant 0 : i32
    %c0_i32_0 = arith.constant 0 : i32
    %c0_i32_1 = arith.constant 0 : i32
    return %c0_i32, %c0_i32_0 : i32, i32
  }
  func.func @transform_15(%arg0: i32) -> (i32, i32) {
    %c0_i32 = arith.constant 0 : i32
    %c0_i32_0 = arith.constant 0 : i32
    %c0_i32_1 = arith.constant 0 : i32
    return %c0_i32, %c0_i32_0 : i32, i32
  }
  func.func @transform_16(%arg0: i32) -> (i32, i32) {
    %c0_i32 = arith.constant 0 : i32
    %c0_i32_0 = arith.constant 0 : i32
    %c0_i32_1 = arith.constant 0 : i32
    return %c0_i32, %c0_i32_0 : i32, i32
  }
  func.func @transform_17(%arg0: i32) -> (i32, i32) {
    %c0_i32 = arith.constant 0 : i32
    %c0_i32_0 = arith.constant 0 : i32
    %c0_i32_1 = arith.constant 0 : i32
    return %c0_i32, %c0_i32_0 : i32, i32
  }
  func.func @transform_18(%arg0: i32) -> (i32, i32) {
    %c0_i32 = arith.constant 0 : i32
    %c0_i32_0 = arith.constant 0 : i32
    %c0_i32_1 = arith.constant 0 : i32
    return %c0_i32, %c0_i32_0 : i32, i32
  }
  func.func @transform_19(%arg0: i32) -> (i32, i32) {
    %c0_i32 = arith.constant 0 : i32
    %c0_i32_0 = arith.constant 0 : i32
    %c0_i32_1 = arith.constant 0 : i32
    return %c0_i32, %c0_i32_0 : i32, i32
  }
  func.func @transform_20(%arg0: i32) -> (i32, i32) {
    %c0_i32 = arith.constant 0 : i32
    %c0_i32_0 = arith.constant 0 : i32
    return %arg0, %c0_i32 : i32, i32
  }
  func.func @transform_21(%arg0: i32) -> (i32, i32) {
    %c0_i32 = arith.constant 0 : i32
    %c0_i32_0 = arith.constant 0 : i32
    return %arg0, %c0_i32 : i32, i32
  }
  func.func @transform_22(%arg0: i32) -> (i32, i32) {
    %c0_i32 = arith.constant 0 : i32
    %c0_i32_0 = arith.constant 0 : i32
    return %arg0, %c0_i32 : i32, i32
  }
  func.func @transform_23(%arg0: i32) -> (i32, i32) {
    %c0_i32 = arith.constant 0 : i32
    %c0_i32_0 = arith.constant 0 : i32
    return %arg0, %c0_i32 : i32, i32
  }
  func.func @transform_24(%arg0: i32) -> (i32, i32) {
    %c0_i32 = arith.constant 0 : i32
    %c0_i32_0 = arith.constant 0 : i32
    return %arg0, %c0_i32 : i32, i32
  }
}

</mosaic_0001>

<bundles_post_ra>
// kernel: tpu_custom_call.1
= control target key start
LH: loop header
LB: loop body
LE: loop exit
PB: predicated region body
PF: predicated region fallthrough
CT: control target
= control target key end

     0   :  { %s4164_s0 = inlined_call_operand.hbm [shape: f32[8,256], index: 0, kind: input, shape index: {}]   ;;  %s4165_s1 = inlined_call_operand.hbm [shape: bf16[16,8,128], index: 1, kind: input, shape index: {}]   ;;  %s4166_s2 = inlined_call_operand.hbm [shape: bf16[16,8,128], index: 2, kind: input, shape index: {}]   ;;  %s4167_s3 = inlined_call_operand.hbm [shape: bf16[8,8,128], index: 3, kind: input, shape index: {}]   ;;  %s4168_s4 = inlined_call_operand.hbm [shape: s32[8,16], index: 4, kind: input, shape index: {}]   ;;  %s4169_s5 = inlined_call_operand.vmem [shape: s32[8,16], index: 5, kind: input, shape index: {}]   ;;  %s4170_s6 = inlined_call_operand.hbm [shape: f32[8,8,128], index: 6, kind: input, shape index: {}]   ;;  %s4171_s7 = inlined_call_operand.hbm [shape: f32[8,128], index: 7, kind: input, shape index: {}]   ;;  %s4172_s8 = inlined_call_operand.hbm [shape: bf16[256,512], index: 8, kind: input, shape index: {}]   ;;  %s4173_s9 = inlined_call_operand.vmem [shape: f32[1,512], index: 9, kind: input, shape index: {}]   ;;  %s4174_s10 = inlined_call_operand.hbm [shape: bf16[128,128], index: 10, kind: input, shape index: {}]   ;;  %s4175_s11 = inlined_call_operand.vmem [shape: f32[1,128], index: 11, kind: input, shape index: {}]   ;;  %s4176_s12 = inlined_call_operand.hbm [shape: bf16[128,128], index: 12, kind: input, shape index: {}]   ;;  %s4177_s13 = inlined_call_operand.vmem [shape: f32[1,128], index: 13, kind: input, shape index: {}]   ;;  %s4178_s14 = inlined_call_operand.hbm [shape: bf16[128,128], index: 14, kind: input, shape index: {}]   ;;  %s4179_s15 = inlined_call_operand.vmem [shape: f32[1,128], index: 15, kind: input, shape index: {}]   ;;  %s4180_s16 = inlined_call_operand.hbm [shape: bf16[128,128], index: 16, kind: input, shape index: {}]   ;;  %s4181_s17 = inlined_call_operand.vmem [shape: f32[1,128], index: 17, kind: input, shape index: {}]   ;;  %s4182_s18 = inlined_call_operand.hbm [shape: bf16[128,256], index: 18, kind: input, shape index: {}]   ;;  %s4183_s19 = inlined_call_operand.vmem [shape: f32[1,256], index: 19, kind: input, shape index: {}]   ;;  %s4184_s20 = inlined_call_operand.hbm [shape: f32[8,128], index: 20, kind: output, shape index: {0}]   ;;  %s4185_s21 = inlined_call_operand.hbm [shape: f32[8,128], index: 21, kind: output, shape index: {1}]   ;;  %s4186_s22 = inlined_call_operand.hbm [shape: f32[8,128], index: 22, kind: output, shape index: {2}]   ;;  %s4187_s23 = inlined_call_operand.hbm [shape: f32[8,128], index: 23, kind: output, shape index: {3}]   ;;  %s4188_s24 = inlined_call_operand.hbm [shape: f32[8,128], index: 24, kind: output, shape index: {4}]  }
   0x1   :  { %4213 = sst [smem:[#allocation76_spill]] %s4164_s0 }
   0x2   :  { %4214 = sst [smem:[#allocation77_spill]] %s4165_s1 }
   0x3   :  { %4215 = sst [smem:[#allocation78_spill]] %s4166_s2 }
   0x4   :  { %4216 = sst [smem:[#allocation79_spill]] %s4167_s3 }
   0x5   :  { %4217 = sst [smem:[#allocation80_spill]] %s4168_s4 }
   0x6   :  { %4218 = sst [smem:[#allocation81_spill]] %s4169_s5 }
   0x7   :  { %4219 = sst [smem:[#allocation82_spill]] %s4170_s6 }
   0x8   :  { %4220 = sst [smem:[#allocation83_spill]] %s4171_s7 }
   0x9   :  { %4221 = sst [smem:[#allocation84_spill]] %s4172_s8 }
   0xa   :  { %4222 = sst [smem:[#allocation85_spill]] %s4184_s20 }
   0xb   :  { %30 = vsyncpa [#allocation3], 0 }
   0xc   :  { %31 = vsyncpa [#allocation6], 0 }
   0xd   :  { %32 = vsyncpa [#allocation9], 0 }
   0xe   :  { %33 = vsyncpa [#allocation12], 0 }
   0xf   :  { %34 = vsyncpa [#allocation15], 0 }
  0x10   :  { %35 = vsyncpa [#allocation18], 0 }
  0x11   :  { %36 = vsyncpa [#allocation21], 0 }
  0x12   :  { %37 = vsyncpa [#allocation4], 0 }
  0x13   :  { %38 = vsyncpa [#allocation25], 0 }
  0x14   :  { %39 = vsyncpa [#allocation28], 0  ;;  %s3442_s5 = smov [#allocation5]  }
  0x15   :  { %s55_s26 = sshll.u32 %s3442_s5, 4  ;;  %s56_s26 = int_to_ptr.vmem [resolvable:$true] %s55_s26 }
  0x16   :  { %s3022_s27 = scalar_lea.vmem %s56_s26, 1024  ;;  %p3027_p1 = scmp.lt.s32.totalorder %s56_s26, %s56_s26 }
  0x17   :  { %p3023_p0 = scmp.ne.s32.totalorder %s56_s26, %s3022_s27  ;;  %p3028_p2 = scmp.lt.s32.totalorder %s3022_s27, %s3022_s27 }
  0x19   :  { %p3029_p3 = por %p3028_p2, %p3027_p1 }
  0x1b   :  { %p3030_p4 = pnand %p3029_p3, %p3023_p0 }
  0x1d   :  { %3033 = shalt.err (!%p3030_p4)
}
  0x1e   :  { %s4189_s28 = smov 64   ;;  %s4191_s6 = smov 4  }
  0x1f   :  { %s4223_s0 = sld [smem:[#allocation77_spill]]  ;;  %s3445_s7 = smov [#allocation8]  }
  0x20   :  { %s79_s30 = sshll.u32 %s3445_s7, 4  ;;  %s3446_s3 = smov [#allocation11]   ;;  %s80_s30 = int_to_ptr.vmem [resolvable:$true] %s79_s30 }
  0x21   :  { %s103_s25 = sshll.u32 %s3446_s3, 4  ;;  %s3042_s8 = scalar_lea.vmem %s80_s30, 512  ;;  %s104_s25 = int_to_ptr.vmem [resolvable:$true] %s103_s25 }
  0x22   :  { %p3043_p5 = scmp.ne.s32.totalorder %s80_s30, %s3042_s8  ;;  %p3047_p6 = scmp.lt.s32.totalorder %s80_s30, %s80_s30 }
  0x23   :  { %p3048_p7 = scmp.lt.s32.totalorder %s3042_s8, %s3042_s8 }
  0x25   :  { %61 = dma.hbm_to_vmem [thread:$0]  %s4223_s0, 1024, %s56_s26, [#allocation6], %s4189_s28, %s4189_s28, %s4191_s6  }
  0x26   :  { %p3049_p8 = por %p3048_p7, %p3047_p6 }
  0x28   :  { %p3050_p9 = pnand %p3049_p8, %p3043_p5 }
  0x2a   :  { %3053 = shalt.err (!%p3050_p9)
}
  0x2b   :  { %s4224_s5 = sld [smem:[#allocation79_spill]]  ;;  %s3062_s26 = scalar_lea.vmem %s104_s25, 1024 }
  0x2c   :  { %p3063_p10 = scmp.ne.s32.totalorder %s104_s25, %s3062_s26  ;;  %p3067_p11 = scmp.lt.s32.totalorder %s104_s25, %s104_s25 }
  0x2d   :  { %p3068_p12 = scmp.lt.s32.totalorder %s3062_s26, %s3062_s26 }
  0x2f   :  { %p3069_p13 = por %p3068_p12, %p3067_p11 }
  0x31   :  { %85 = dma.hbm_to_vmem [thread:$0]  %s4224_s5, 512, %s80_s30, [#allocation9], %s4189_s28, %s4189_s28, %s4191_s6  }
  0x32   :  { %p3070_p0 = pnand %p3069_p13, %p3063_p10 }
  0x34   :  { %3073 = shalt.err (!%p3070_p0)
}
  0x35   :  { %s4193_s27 = smov 128   ;;  %s3448_s2 = smov 8  }
  0x36   :  { %s4225_s7 = sld [smem:[#allocation82_spill]]  ;;  %s3449_s3 = smov [#allocation14]  }
  0x37   :  { %s125_s8 = sshll.u32 %s3449_s3, 4  ;;  %s126_s8 = int_to_ptr.vmem [resolvable:$true] %s125_s8 }
  0x38   :  { %s3082_s30 = scalar_lea.vmem %s126_s8, 8192  ;;  %p3087_p2 = scmp.lt.s32.totalorder %s126_s8, %s126_s8 }
  0x39   :  { %p3083_p1 = scmp.ne.s32.totalorder %s126_s8, %s3082_s30  ;;  %p3088_p3 = scmp.lt.s32.totalorder %s3082_s30, %s3082_s30 }
  0x3b   :  { %p3089_p4 = por %p3088_p3, %p3087_p2 }
  0x3c   :  { %109 = dma.hbm_to_vmem [thread:$0]  %s4225_s7, 1024, %s104_s25, [#allocation12], %s4193_s27, %s4193_s27, %s3448_s2  }
  0x3d   :  { %p3090_p5 = pnand %p3089_p4, %p3083_p1 }
  0x3f   :  { %3093 = shalt.err (!%p3090_p5)
}
  0x40   :  { %s3450_s4 = smov 256   ;;  %s3451_s1 = smov 16  }
  0x41   :  { %s4226_s28 = sld [smem:[#allocation84_spill]]  ;;  %s3452_s6 = smov [#allocation17]  }
  0x42   :  { %s153_s20 = sshll.u32 %s3452_s6, 4  ;;  %s3453_s29 = smov [#allocation20]   ;;  %s154_s20 = int_to_ptr.vmem [resolvable:$true] %s153_s20 }
  0x43   :  { %s181_s25 = sshll.u32 %s3453_s29, 4  ;;  %s3102_s0 = scalar_lea.vmem %s154_s20, 1024  ;;  %s182_s25 = int_to_ptr.vmem [resolvable:$true] %s181_s25 }
  0x44   :  { %p3103_p6 = scmp.ne.s32.totalorder %s154_s20, %s3102_s0  ;;  %p3107_p7 = scmp.lt.s32.totalorder %s154_s20, %s154_s20 }
  0x45   :  { %p3108_p8 = scmp.lt.s32.totalorder %s3102_s0, %s3102_s0 }
  0x47   :  { %131 = dma.hbm_to_vmem [thread:$0]  %s4226_s28, 8192, %s126_s8, [#allocation15], %s3450_s4, %s3450_s4, %s3451_s1  }
  0x48   :  { %p3109_p9 = por %p3108_p8, %p3107_p7 }
  0x4a   :  { %p3110_p10 = pnand %p3109_p9, %p3103_p6 }
  0x4c   :  { %3113 = shalt.err (!%p3110_p10)
}
  0x4d   :  { %s4227_s7 = smov 4   ;;  %s4228_s3 = smov 64  }
  0x4e   :  { %159 = dma.hbm_to_vmem [thread:$0]  %s4176_s12, 1024, %s154_s20, [#allocation18], %s4228_s3, %s4228_s3, %s4227_s7  }
  0x4f   :  { %s3122_s28 = scalar_lea.vmem %s182_s25, 1024  ;;  %p3127_p12 = scmp.lt.s32.totalorder %s182_s25, %s182_s25 }
  0x50   :  { %p3123_p11 = scmp.ne.s32.totalorder %s182_s25, %s3122_s28  ;;  %p3128_p13 = scmp.lt.s32.totalorder %s3122_s28, %s3122_s28 }
  0x52   :  { %p3129_p0 = por %p3128_p13, %p3127_p12 }
  0x54   :  { %p3130_p1 = pnand %p3129_p0, %p3123_p11 }
  0x56   :  { %3133 = shalt.err (!%p3130_p1)
}
  0x57   :  { %187 = dma.hbm_to_vmem [thread:$0]  %s4180_s16, 1024, %s182_s25, [#allocation21], %s4228_s3, %s4228_s3, %s4227_s7  }
  0x58   :  { %s3454_s4 = smov [#allocation2]   ;;  %s3455_s5 = smov [#allocation7]  }
  0x59   :  { %s46_s1 = sshll.u32 %s3454_s4, 4  ;;  %s67_s26 = sshll.u32 %s3455_s5, 4  ;;  %s47_s1 = int_to_ptr.vmem [resolvable:$true] %s46_s1  ;;  %s68_s26 = int_to_ptr.vmem [resolvable:$true] %s67_s26 }
  0x5a   :  { %s3142_s12 = scalar_lea.vmem %s47_s1, 256  ;;  %p3147_p3 = scmp.lt.s32.totalorder %s47_s1, %s47_s1 }
  0x5b   :  { %p3143_p2 = scmp.ne.s32.totalorder %s47_s1, %s3142_s12  ;;  %p3148_p4 = scmp.lt.s32.totalorder %s3142_s12, %s3142_s12 }
  0x5d   :  { %p3149_p5 = por %p3148_p4, %p3147_p3 }
  0x5f   :  { %p3150_p6 = pnand %p3149_p5, %p3143_p2 }
  0x61   :  { %3153 = shalt.err (!%p3150_p6)
}
  0x62   :  { %s4229_s29 = sld [smem:[#allocation76_spill]]  ;;  %s3162_s0 = scalar_lea.vmem %s68_s26, 1024 }
  0x63   :  { %p3163_p7 = scmp.ne.s32.totalorder %s68_s26, %s3162_s0  ;;  %p3167_p8 = scmp.lt.s32.totalorder %s68_s26, %s68_s26 }
  0x64   :  { %p3168_p9 = scmp.lt.s32.totalorder %s3162_s0, %s3162_s0 }
  0x66   :  { %p3169_p10 = por %p3168_p9, %p3167_p8 }
  0x68   :  { %49 = dma.hbm_to_vmem [thread:$0]  %s4229_s29, 256, %s47_s1, [#allocation3]  }
  0x69   :  { %p3170_p11 = pnand %p3169_p10, %p3163_p7 }
  0x6b   :  { %3173 = shalt.err (!%p3170_p11)
}
  0x6c   :  { %s4230_s30 = sld [smem:[#allocation78_spill]]  ;;  %s3456_s28 = smov [#allocation10]  }
  0x6d   :  { %s92_s6 = sshll.u32 %s3456_s28, 4  ;;  %s3457_s8 = smov [#allocation13]   ;;  %s93_s6 = int_to_ptr.vmem [resolvable:$true] %s92_s6 }
  0x6e   :  { %s116_s4 = sshll.u32 %s3457_s8, 4  ;;  %s3182_s1 = scalar_lea.vmem %s93_s6, 128  ;;  %s117_s4 = int_to_ptr.vmem [resolvable:$true] %s116_s4 }
  0x6f   :  { %p3183_p12 = scmp.ne.s32.totalorder %s93_s6, %s3182_s1  ;;  %p3187_p13 = scmp.lt.s32.totalorder %s93_s6, %s93_s6 }
  0x70   :  { %p3188_p0 = scmp.lt.s32.totalorder %s3182_s1, %s3182_s1 }
  0x72   :  { %73 = dma.hbm_to_vmem [thread:$0]  %s4230_s30, 1024, %s68_s26, [#allocation6], %s4228_s3, %s4228_s3, %s4227_s7  }
  0x73   :  { %p3189_p1 = por %p3188_p0, %p3187_p13 }
  0x75   :  { %p3190_p2 = pnand %p3189_p1, %p3183_p12 }
  0x77   :  { %3193 = shalt.err (!%p3190_p2)
}
  0x78   :  { %s4231_s20 = sld [smem:[#allocation80_spill]]  ;;  %s3202_s27 = scalar_lea.vmem %s117_s4, 128 }
  0x79   :  { %p3203_p3 = scmp.ne.s32.totalorder %s117_s4, %s3202_s27  ;;  %p3207_p4 = scmp.lt.s32.totalorder %s117_s4, %s117_s4 }
  0x7a   :  { %p3208_p5 = scmp.lt.s32.totalorder %s3202_s27, %s3202_s27 }
  0x7c   :  { %p3209_p6 = por %p3208_p5, %p3207_p4 }
  0x7e   :  { %95 = dma.hbm_to_vmem [thread:$0]  %s4231_s20, 128, %s93_s6, [#allocation9]  }
  0x7f   :  { %p3210_p7 = pnand %p3209_p6, %p3203_p3 }
  0x81   :  { %3213 = shalt.err (!%p3210_p7)
}
  0x82   :  { %s4232_s0 = sld [smem:[#allocation83_spill]]  ;;  %s3458_s16 = smov [#allocation16]  }
  0x83   :  { %s139_s25 = sshll.u32 %s3458_s16, 4  ;;  %s3459_s30 = smov [#allocation19]   ;;  %s140_s25 = int_to_ptr.vmem [resolvable:$true] %s139_s25 }
  0x84   :  { %s167_s28 = sshll.u32 %s3459_s30, 4  ;;  %s3222_s8 = scalar_lea.vmem %s140_s25, 1024  ;;  %s168_s28 = int_to_ptr.vmem [resolvable:$true] %s167_s28 }
  0x85   :  { %p3223_p8 = scmp.ne.s32.totalorder %s140_s25, %s3222_s8  ;;  %p3227_p9 = scmp.lt.s32.totalorder %s140_s25, %s140_s25 }
  0x86   :  { %p3228_p10 = scmp.lt.s32.totalorder %s3222_s8, %s3222_s8 }
  0x88   :  { %119 = dma.hbm_to_vmem [thread:$0]  %s4232_s0, 128, %s117_s4, [#allocation12]  }
  0x89   :  { %p3229_p11 = por %p3228_p10, %p3227_p9 }
  0x8b   :  { %p3230_p12 = pnand %p3229_p11, %p3223_p8 }
  0x8d   :  { %3233 = shalt.err (!%p3230_p12)
}
  0x8e   :  { %145 = dma.hbm_to_vmem [thread:$0]  %s4174_s10, 1024, %s140_s25, [#allocation15], %s4228_s3, %s4228_s3, %s4227_s7  }
  0x8f   :  { %s3242_s4 = scalar_lea.vmem %s168_s28, 1024  ;;  %p3247_p0 = scmp.lt.s32.totalorder %s168_s28, %s168_s28 }
  0x90   :  { %p3243_p13 = scmp.ne.s32.totalorder %s168_s28, %s3242_s4  ;;  %p3248_p1 = scmp.lt.s32.totalorder %s3242_s4, %s3242_s4 }
  0x92   :  { %p3249_p2 = por %p3248_p1, %p3247_p0 }
  0x94   :  { %p3250_p3 = pnand %p3249_p2, %p3243_p13 }
  0x96   :  { %3253 = shalt.err (!%p3250_p3)
}
  0x97   :  { %173 = dma.hbm_to_vmem [thread:$0]  %s4178_s14, 1024, %s168_s28, [#allocation18], %s4228_s3, %s4228_s3, %s4227_s7  }
  0x98   :  { %s3460_s20 = smov [#allocation22]  }
  0x99   :  { %s195_s27 = sshll.u32 %s3460_s20, 4  ;;  %s196_s27 = int_to_ptr.vmem [resolvable:$true] %s195_s27 }
  0x9a   :  { %s3262_s26 = scalar_lea.vmem %s196_s27, 2048  ;;  %p3267_p5 = scmp.lt.s32.totalorder %s196_s27, %s196_s27 }
  0x9b   :  { %p3263_p4 = scmp.ne.s32.totalorder %s196_s27, %s3262_s26  ;;  %p3268_p6 = scmp.lt.s32.totalorder %s3262_s26, %s3262_s26 }
  0x9d   :  { %p3269_p7 = por %p3268_p6, %p3267_p5 }
  0x9f   :  { %p3270_p8 = pnand %p3269_p7, %p3263_p4 }
  0xa1   :  { %3273 = shalt.err (!%p3270_p8)
}
  0xa2   :  { %s4233_s10 = smov 128  }
  0xa3   :  { %201 = dma.hbm_to_vmem [thread:$0]  %s4182_s18, 2048, %s196_s27, [#allocation21], %s4233_s10, %s4233_s10, %s3448_s2  }
  0xa4   :  { %3398 = dma.done.wait [#allocation3], 256  }
  0xa5   :  { %3399 = vsyncadd [#allocation3], 4294967040 }
  0xa6   :  { %3400 = dma.done.wait [#allocation6], 2048  }
  0xa7   :  { %3401 = vsyncadd [#allocation6], 4294965248 }
  0xa8   :  { %3402 = dma.done.wait [#allocation9], 640  }
  0xa9   :  { %3403 = vsyncadd [#allocation9], 4294966656 }
  0xaa   :  { %3404 = dma.done.wait [#allocation12], 1152  }
  0xab   :  { %3405 = vsyncadd [#allocation12], 4294966144 }
  0xac   :  { %3406 = dma.done.wait [#allocation15], 9216  }
  0xad   :  { %3407 = vsyncadd [#allocation15], 4294958080 }
  0xae   :  { %3408 = dma.done.wait [#allocation18], 2048  }
  0xaf   :  { %3409 = vsyncadd [#allocation18], 4294965248 }
  0xb0   :  { %3410 = dma.done.wait [#allocation21], 3072  }
  0xb1   :  { %3411 = vsyncadd [#allocation21], 4294964224  ;;  %v3660_v0 = vld [vmem:[#allocation7] sm:$0xf]  ;;  %v3662_v1 = vld [vmem:[#allocation7 + $0x4] sm:$0xf] }
  0xb2   :  { %v3664_v2 = vld [vmem:[#allocation7 + $0x8] sm:$0xf]  ;;  %v3666_v3 = vld [vmem:[#allocation7 + $0xc] sm:$0xf]  ;;  %v3668_v4 = vld [vmem:[#allocation7 + $0x10] sm:$0xf] }
  0xb3   :  { %v3670_v5 = vld [vmem:[#allocation7 + $0x14] sm:$0xf]  ;;  %v3672_v6 = vld [vmem:[#allocation7 + $0x18] sm:$0xf]  ;;  %v3674_v7 = vld [vmem:[#allocation7 + $0x1c] sm:$0xf] }
  0xb4   :  { %v3676_v8 = vld [vmem:[#allocation7 + $0x20] sm:$0xf]  ;;  %v3678_v9 = vld [vmem:[#allocation7 + $0x24] sm:$0xf]  ;;  %v3680_v10 = vld [vmem:[#allocation7 + $0x28] sm:$0xf] }
  0xb5   :  { %v3682_v11 = vld [vmem:[#allocation7 + $0x2c] sm:$0xf]  ;;  %v3684_v12 = vld [vmem:[#allocation7 + $0x30] sm:$0xf]  ;;  %v3686_v13 = vld [vmem:[#allocation7 + $0x34] sm:$0xf] }
  0xb6   :  { %v3688_v14 = vld [vmem:[#allocation7 + $0x38] sm:$0xf]  ;;  %v3690_v15 = vld [vmem:[#allocation7 + $0x3c] sm:$0xf]  ;;  %v3692_v16 = vld [vmem:[#allocation8] sm:$0xf] }
  0xb7   :  { %v3694_v17 = vld [vmem:[#allocation8 + $0x4] sm:$0xf]  ;;  %v3696_v18 = vld [vmem:[#allocation8 + $0x8] sm:$0xf]  ;;  %v3698_v19 = vld [vmem:[#allocation8 + $0xc] sm:$0xf] }
  0xb8   :  { %4234 = vst [vmem:[#allocation40_spill] sm:$0xff] %v3696_v18  ;;  %4235 = vst [vmem:[#allocation41_spill] sm:$0xff] %v3698_v19  ;;  %v3700_v20 = vld [vmem:[#allocation8 + $0x10] sm:$0xf]  ;;  %v3702_v21 = vld [vmem:[#allocation8 + $0x14] sm:$0xf] }
  0xb9   :  { %4236 = vst [vmem:[#allocation42_spill] sm:$0xff] %v3700_v20  ;;  %4237 = vst [vmem:[#allocation43_spill] sm:$0xff] %v3702_v21  ;;  %v3704_v22 = vld [vmem:[#allocation8 + $0x18] sm:$0xf]  ;;  %v3706_v23 = vld [vmem:[#allocation8 + $0x1c] sm:$0xf] }
  0xba   :  { %4238 = vst [vmem:[#allocation44_spill] sm:$0xff] %v3704_v22  ;;  %4239 = vst [vmem:[#allocation45_spill] sm:$0xff] %v3706_v23  ;;  %v3708_v24 = vld [vmem:[#allocation10] sm:$0xff]  ;;  %s4240_s2 = sld [smem:[#allocation81_spill]]  ;;  %v3715_v26 = vld [vmem:[#allocation13] sm:$0xff]  ;;  %vm3462_vm0 = vmmov 0  }
  0xbb   :  { %4241 = vst [vmem:[#allocation46_spill] sm:$0xff] %v3715_v26  ;;  %v3717_v27 = vld [vmem:[#allocation19] sm:$0xf]  ;;  %v3719_v28 = vld [vmem:[#allocation19 + $0x4] sm:$0xf]  ;;  %v3784_v61 = vld [vmem:[#allocation22 + $0x8] sm:$0xff] }
  0xbc   :  { %v3721_v29 = vld [vmem:[#allocation19 + $0x8] sm:$0xf]  ;;  %v3724_v31 = vld [vmem:[#allocation19 + $0xc] sm:$0xf]  ;;  %v3726_v32 = vld [vmem:[#allocation19 + $0x10] sm:$0xf] }
  0xbd   :  { %v3728_v33 = vld [vmem:[#allocation19 + $0x14] sm:$0xf]  ;;  %v3730_v34 = vld [vmem:[#allocation19 + $0x18] sm:$0xf]  ;;  %v3732_v35 = vld [vmem:[#allocation19 + $0x1c] sm:$0xf] }
  0xbe   :  { %v3734_v36 = vld [vmem:[#allocation19 + $0x20] sm:$0xf]  ;;  %v3736_v37 = vld [vmem:[#allocation19 + $0x24] sm:$0xf]  ;;  %v3738_v38 = vld [vmem:[#allocation19 + $0x28] sm:$0xf] }
  0xbf   :  { %v3740_v39 = vld [vmem:[#allocation19 + $0x2c] sm:$0xf]  ;;  %v3742_v40 = vld [vmem:[#allocation19 + $0x30] sm:$0xf]  ;;  %v3744_v41 = vld [vmem:[#allocation19 + $0x34] sm:$0xf] }
  0xc0   :  { %v3713_v25 = vld [vmem:[%s4240_s2] sm:$0xff]  ;;  %v3746_v42 = vld [vmem:[#allocation19 + $0x38] sm:$0xf]  ;;  %v3748_v43 = vld [vmem:[#allocation19 + $0x3c] sm:$0xf]  ;;  %4255 = vst [vmem:[#allocation60_spill] sm:$0xff] %v3784_v61 }
  0xc1   :  { %v3750_v44 = vld [vmem:[#allocation20] sm:$0xf]  ;;  %v3752_v45 = vld [vmem:[#allocation20 + $0x4] sm:$0xf]  ;;  %v3754_v46 = vld [vmem:[#allocation20 + $0x8] sm:$0xf] }
  0xc2   :  { %4242 = vst [vmem:[#allocation47_spill] sm:$0xff] %v3750_v44  ;;  %4243 = vst [vmem:[#allocation48_spill] sm:$0xff] %v3752_v45  ;;  %v3756_v47 = vld [vmem:[#allocation20 + $0xc] sm:$0xf]  ;;  %v3758_v48 = vld [vmem:[#allocation20 + $0x10] sm:$0xf] }
  0xc3   :  { %4244 = vst [vmem:[#allocation49_spill] sm:$0xff] %v3754_v46  ;;  %4245 = vst [vmem:[#allocation50_spill] sm:$0xff] %v3756_v47  ;;  %v3760_v49 = vld [vmem:[#allocation20 + $0x14] sm:$0xf]  ;;  %v3762_v50 = vld [vmem:[#allocation20 + $0x18] sm:$0xf] }
  0xc4   :  { %4246 = vst [vmem:[#allocation51_spill] sm:$0xff] %v3758_v48  ;;  %4247 = vst [vmem:[#allocation52_spill] sm:$0xff] %v3760_v49  ;;  %v3764_v51 = vld [vmem:[#allocation20 + $0x1c] sm:$0xf]  ;;  %v3766_v52 = vld [vmem:[#allocation20 + $0x20] sm:$0xf] }
  0xc5   :  { %4248 = vst [vmem:[#allocation53_spill] sm:$0xff] %v3762_v50  ;;  %4249 = vst [vmem:[#allocation54_spill] sm:$0xff] %v3764_v51  ;;  %v3768_v53 = vld [vmem:[#allocation20 + $0x24] sm:$0xf]  ;;  %v3770_v54 = vld [vmem:[#allocation20 + $0x28] sm:$0xf] }
  0xc6   :  { %4250 = vst [vmem:[#allocation55_spill] sm:$0xff] %v3766_v52  ;;  %4251 = vst [vmem:[#allocation56_spill] sm:$0xff] %v3768_v53  ;;  %v3772_v55 = vld [vmem:[#allocation20 + $0x2c] sm:$0xf]  ;;  %v3774_v56 = vld [vmem:[#allocation20 + $0x30] sm:$0xf] }
  0xc7   :  { %4252 = vst [vmem:[#allocation57_spill] sm:$0xff] %v3770_v54  ;;  %4253 = vst [vmem:[#allocation58_spill] sm:$0xff] %v3772_v55  ;;  %v3776_v57 = vld [vmem:[#allocation20 + $0x34] sm:$0xf]  ;;  %v3778_v58 = vld [vmem:[#allocation20 + $0x38] sm:$0xf] }
  0xc8   :  { %v3780_v59 = vld [vmem:[#allocation20 + $0x3c] sm:$0xf]  ;;  %v3782_v60 = vld [vmem:[#allocation22] sm:$0xff]  ;;  %v3786_v62 = vld [vmem:[#allocation22 + $0x10] sm:$0xff]  ;;  %vm1326_vm1 = vcmask 1041409   ;;  %vm1328_vm2 = vcmask 1042434  }
  0xc9   :  { %4254 = vst [vmem:[#allocation59_spill] sm:$0xff] %v3782_v60  ;;  %4256 = vst [vmem:[#allocation61_spill] sm:$0xff] %v3786_v62  ;;  %v3788_v63 = vld [vmem:[#allocation22 + $0x18] sm:$0xff]  ;;  %v3790_v30 = vld [vmem:[#allocation22 + $0x20] sm:$0xff]  ;;  %vm1330_vm3 = vcmask 1043459   ;;  %vm1332_vm4 = vcmask 1044484  }
  0xca   :  { %4257 = vst [vmem:[#allocation62_spill] sm:$0xff] %v3788_v63  ;;  %4258 = vst [vmem:[#allocation63_spill] sm:$0xff] %v3790_v30  ;;  %v3792_v26 = vld [vmem:[#allocation22 + $0x28] sm:$0xff]  ;;  %v3794_v22 = vld [vmem:[#allocation22 + $0x30] sm:$0xff]  ;;  %vm1334_vm5 = vcmask 1045509   ;;  %vm1336_vm6 = vcmask 1046534  }
  0xcb   :  { %4259 = vst [vmem:[#allocation64_spill] sm:$0xff] %v3792_v26  ;;  %4260 = vst [vmem:[#allocation65_spill] sm:$0xff] %v3794_v22  ;;  %v3796_v23 = vld [vmem:[#allocation22 + $0x38] sm:$0xff]  ;;  %v3798_v20 = vld [vmem:[#allocation22 + $0x40] sm:$0xff]  ;;  %vm1338_vm7 = vcmask 1047559   ;;  %vm1383_vm10 = vcmask 130048  }
  0xcc   :  { %4261 = vst [vmem:[#allocation66_spill] sm:$0xff] %v3796_v23  ;;  %4262 = vst [vmem:[#allocation67_spill] sm:$0xff] %v3798_v20  ;;  %v3800_v21 = vld [vmem:[#allocation22 + $0x48] sm:$0xff]  ;;  %v3802_v18 = vld [vmem:[#allocation22 + $0x50] sm:$0xff] }
  0xcd   :  { %4263 = vst [vmem:[#allocation68_spill] sm:$0xff] %v3800_v21  ;;  %4264 = vst [vmem:[#allocation69_spill] sm:$0xff] %v3802_v18  ;;  %v3804_v60 = vld [vmem:[#allocation22 + $0x58] sm:$0xff]  ;;  %v3806_v61 = vld [vmem:[#allocation22 + $0x60] sm:$0xff] }
  0xce   :  { %4265 = vst [vmem:[#allocation70_spill] sm:$0xff] %v3804_v60  ;;  %4266 = vst [vmem:[#allocation71_spill] sm:$0xff] %v3806_v61  ;;  %v3808_v62 = vld [vmem:[#allocation22 + $0x68] sm:$0xff]  ;;  %v3810_v63 = vld [vmem:[#allocation22 + $0x70] sm:$0xff] }
  0xcf   :  { %4267 = vst [vmem:[#allocation72_spill] sm:$0xff] %v3808_v62  ;;  %4268 = vst [vmem:[#allocation73_spill] sm:$0xff] %v3810_v63  ;;  %v3812_v30 = vld [vmem:[#allocation22 + $0x78] sm:$0xff]  ;;  %v3817_v26 = vld [vmem:[%s4183_s19] sm:$0x3] }
  0xd0   :  { %4269 = vst [vmem:[#allocation74_spill] sm:$0xff] %v3812_v30  ;;  %4270 = vst [vmem:[#allocation75_spill] sm:$0xff] %v3817_v26  ;;  %v2780_v22 = vld [vmem:[#allocation14 + $0xe4] ss:$16 sps:$4 sm:$0xff]   ;;  %v2782_v23 = vld [vmem:[#allocation14 + $0xec] ss:$16 sps:$4 sm:$0xff]  }
  0xd1   :  { %v2784_v20 = vld [vmem:[#allocation14 + $0xe0] ss:$16 sps:$4 sm:$0xff]   ;;  %v2785_v21 = vld [vmem:[#allocation14 + $0xe8] ss:$16 sps:$4 sm:$0xff]   ;;  %782 = vmatprep.subr.bf16.mxu0 %v2780_v22  ;;  %v2786_v18 = vld [vmem:[#allocation14 + $0xc4] ss:$16 sps:$4 sm:$0xff]   ;;  %823 = vmatprep.subr.bf16.mxu1 %v2782_v23 }
  0xd2   :  { %783 = vmatpush1.bf16.msra.mxu0 %v2784_v20  ;;  %v2788_v60 = vld [vmem:[#allocation14 + $0xcc] ss:$16 sps:$4 sm:$0xff]   ;;  %824 = vmatpush1.bf16.msra.mxu1 %v2785_v21  ;;  %v2790_v61 = vld [vmem:[#allocation14 + $0xc0] ss:$16 sps:$4 sm:$0xff]   ;;  %v2791_v62 = vld [vmem:[#allocation14 + $0xc8] ss:$16 sps:$4 sm:$0xff]  }
  0xd3   :  { %784 = vmatprep.subr.bf16.mxu0 %v2786_v18  ;;  %825 = vmatprep.subr.bf16.mxu1 %v2788_v60  ;;  %v2792_v63 = vld [vmem:[#allocation14 + $0xa4] ss:$16 sps:$4 sm:$0xff]   ;;  %v2794_v30 = vld [vmem:[#allocation14 + $0xac] ss:$16 sps:$4 sm:$0xff]   ;;  %v2796_v19 = vld [vmem:[#allocation14 + $0xa0] ss:$16 sps:$4 sm:$0xff]  }
  0xd4   :  { %v2797_v44 = vld [vmem:[#allocation14 + $0xa8] ss:$16 sps:$4 sm:$0xff]   ;;  %v2798_v26 = vld [vmem:[#allocation14 + $0x84] ss:$16 sps:$4 sm:$0xff]   ;;  %v2800_v45 = vld [vmem:[#allocation14 + $0x8c] ss:$16 sps:$4 sm:$0xff]  }
  0xd5   :  { %v2802_v22 = vld [vmem:[#allocation14 + $0x80] ss:$16 sps:$4 sm:$0xff]   ;;  %v2803_v20 = vld [vmem:[#allocation14 + $0x88] ss:$16 sps:$4 sm:$0xff]   ;;  %v2804_v21 = vld [vmem:[#allocation14 + $0x64] ss:$16 sps:$4 sm:$0xff]  }
  0xd6   :  { %785 = vmatpush1.bf16.msra.mxu0 %v2790_v61  ;;  %826 = vmatpush1.bf16.msra.mxu1 %v2791_v62  ;;  %v2806_v18 = vld [vmem:[#allocation14 + $0x6c] ss:$16 sps:$4 sm:$0xff]   ;;  %v2808_v23 = vld [vmem:[#allocation14 + $0x60] ss:$16 sps:$4 sm:$0xff]   ;;  %v2809_v60 = vld [vmem:[#allocation14 + $0x68] ss:$16 sps:$4 sm:$0xff]  }
  0xd7   :  { %786 = vmatprep.subr.bf16.mxu0 %v2792_v63  ;;  %827 = vmatprep.subr.bf16.mxu1 %v2794_v30  ;;  %v2810_v61 = vld [vmem:[#allocation14 + $0x44] ss:$16 sps:$4 sm:$0xff]   ;;  %v2812_v62 = vld [vmem:[#allocation14 + $0x4c] ss:$16 sps:$4 sm:$0xff]   ;;  %v2814_v63 = vld [vmem:[#allocation14 + $0x40] ss:$16 sps:$4 sm:$0xff]  }
  0xd8   :  { %v2816_v30 = vld [vmem:[#allocation14 + $0x24] ss:$16 sps:$4 sm:$0xff]   ;;  %v2851_v46 = vld [vmem:[#allocation14 + $0x188] ss:$16 sps:$4 sm:$0xff]  }
  0xd9   :  { %v2864_v47 = vld [vmem:[#allocation14 + $0x124] ss:$16 sps:$4 sm:$0xff]  }
  0xda   :  { %787 = vmatpush1.bf16.msra.mxu0 %v2796_v19  ;;  %828 = vmatpush1.bf16.msra.mxu1 %v2797_v44  ;;  %v2815_v19 = vld [vmem:[#allocation14 + $0x48] ss:$16 sps:$4 sm:$0xff]   ;;  %v2820_v44 = vld [vmem:[#allocation14 + $0x20] ss:$16 sps:$4 sm:$0xff]   ;;  %v2870_v48 = vld [vmem:[#allocation14 + $0x104] ss:$16 sps:$4 sm:$0xff]  }
  0xdb   :  { %788 = vmatprep.subr.bf16.mxu0 %v2798_v26  ;;  %829 = vmatprep.subr.bf16.mxu1 %v2800_v45  ;;  %v2818_v26 = vld [vmem:[#allocation14 + $0x2c] ss:$16 sps:$4 sm:$0xff]   ;;  %v2821_v45 = vld [vmem:[#allocation14 + $0x28] ss:$16 sps:$4 sm:$0xff]  }
  0xde   :  { %789 = vmatpush1.bf16.msra.mxu0 %v2802_v22  ;;  %830 = vmatpush1.bf16.msra.mxu1 %v2803_v20  ;;  %v2822_v22 = vld [vmem:[#allocation14 + $0x4] ss:$16 sps:$4 sm:$0xff]   ;;  %v2824_v20 = vld [vmem:[#allocation14 + $0xc] ss:$16 sps:$4 sm:$0xff]  }
  0xdf   :  { %790 = vmatprep.subr.bf16.mxu0 %v2804_v21  ;;  %831 = vmatprep.subr.bf16.mxu1 %v2806_v18  ;;  %v2826_v21 = vld [vmem:[#allocation14] ss:$16 sps:$4 sm:$0xff]   ;;  %v2827_v18 = vld [vmem:[#allocation14 + $0x8] ss:$16 sps:$4 sm:$0xff]  }
  0xe2   :  { %791 = vmatpush1.bf16.msra.mxu0 %v2808_v23  ;;  %832 = vmatpush1.bf16.msra.mxu1 %v2809_v60  ;;  %v2828_v23 = vld [vmem:[#allocation14 + $0x1e4] ss:$16 sps:$4 sm:$0xff]   ;;  %v2830_v60 = vld [vmem:[#allocation14 + $0x1ec] ss:$16 sps:$4 sm:$0xff]  }
  0xe3   :  { %792 = vmatprep.subr.bf16.mxu0 %v2810_v61  ;;  %833 = vmatprep.subr.bf16.mxu1 %v2812_v62  ;;  %v2832_v61 = vld [vmem:[#allocation14 + $0x1e0] ss:$16 sps:$4 sm:$0xff]   ;;  %v2833_v62 = vld [vmem:[#allocation14 + $0x1e8] ss:$16 sps:$4 sm:$0xff]  }
  0xe6   :  { %793 = vmatpush1.bf16.msra.mxu0 %v2814_v63  ;;  %834 = vmatpush1.bf16.msra.mxu1 %v2815_v19  ;;  %v2834_v63 = vld [vmem:[#allocation14 + $0x1c4] ss:$16 sps:$4 sm:$0xff]   ;;  %v2836_v19 = vld [vmem:[#allocation14 + $0x1cc] ss:$16 sps:$4 sm:$0xff]  }
  0xe7   :  { %794 = vmatprep.subr.bf16.mxu0 %v2816_v30  ;;  %835 = vmatprep.subr.bf16.mxu1 %v2818_v26  ;;  %v2838_v30 = vld [vmem:[#allocation14 + $0x1c0] ss:$16 sps:$4 sm:$0xff]   ;;  %v2839_v26 = vld [vmem:[#allocation14 + $0x1c8] ss:$16 sps:$4 sm:$0xff]  }
  0xea   :  { %795 = vmatpush1.bf16.msra.mxu0 %v2820_v44  ;;  %836 = vmatpush1.bf16.msra.mxu1 %v2821_v45  ;;  %v2840_v44 = vld [vmem:[#allocation14 + $0x1a4] ss:$16 sps:$4 sm:$0xff]   ;;  %v2842_v45 = vld [vmem:[#allocation14 + $0x1ac] ss:$16 sps:$4 sm:$0xff]  }
  0xeb   :  { %796 = vmatprep.subr.bf16.mxu0 %v2822_v22  ;;  %837 = vmatprep.subr.bf16.mxu1 %v2824_v20  ;;  %v2844_v22 = vld [vmem:[#allocation14 + $0x1a0] ss:$16 sps:$4 sm:$0xff]   ;;  %v2845_v20 = vld [vmem:[#allocation14 + $0x1a8] ss:$16 sps:$4 sm:$0xff]  }
  0xee   :  { %797 = vmatpush1.bf16.msra.mxu0 %v2826_v21  ;;  %838 = vmatpush1.bf16.msra.mxu1 %v2827_v18  ;;  %v2846_v21 = vld [vmem:[#allocation14 + $0x184] ss:$16 sps:$4 sm:$0xff]   ;;  %v2848_v18 = vld [vmem:[#allocation14 + $0x18c] ss:$16 sps:$4 sm:$0xff]  }
  0xef   :  { %798 = vmatprep.subr.bf16.mxu0 %v2828_v23  ;;  %839 = vmatprep.subr.bf16.mxu1 %v2830_v60  ;;  %v2850_v23 = vld [vmem:[#allocation14 + $0x180] ss:$16 sps:$4 sm:$0xff]   ;;  %v3819_v60 = vld [vmem:[#allocation2 + $0x8] sm:$0xff] }
  0xf2   :  { %799 = vmatpush2.bf16.msra.mxu0 %v2832_v61  ;;  %840 = vmatpush2.bf16.msra.mxu1 %v2833_v62  ;;  %v2852_v61 = vld [vmem:[#allocation14 + $0x164] ss:$16 sps:$4 sm:$0xff]   ;;  %v440_v62 = vpack.c.bf16 %v3819_v60, %v3819_v60 }
  0xf3   :  { %800 = vmatprep.subr.bf16.mxu0 %v2834_v63  ;;  %841 = vmatprep.subr.bf16.mxu1 %v2836_v19  ;;  %v2854_v63 = vld [vmem:[#allocation14 + $0x16c] ss:$16 sps:$4 sm:$0xff]   ;;  %v2856_v19 = vld [vmem:[#allocation14 + $0x160] ss:$16 sps:$4 sm:$0xff]  }
  0xf4   :  { %814 = vmatprep.mubr.bf16.mxu0 %v440_v62  ;;  %855 = vmatprep.mubr.bf16.mxu1 %v440_v62  ;;  %v244_v62 = vld [vmem:[#allocation2] sm:$0xff] }
  0xf6   :  { %801 = vmatpush2.bf16.msra.mxu0 %v2838_v30  ;;  %842 = vmatpush2.bf16.msra.mxu1 %v2839_v26  ;;  %v2857_v30 = vld [vmem:[#allocation14 + $0x168] ss:$16 sps:$4 sm:$0xff]   ;;  %v2858_v26 = vld [vmem:[#allocation14 + $0x144] ss:$16 sps:$4 sm:$0xff]  }
  0xf7   :  { %802 = vmatprep.subr.bf16.mxu0 %v2840_v44  ;;  %843 = vmatprep.subr.bf16.mxu1 %v2842_v45  ;;  %v2860_v44 = vld [vmem:[#allocation14 + $0x14c] ss:$16 sps:$4 sm:$0xff]   ;;  %v2862_v45 = vld [vmem:[#allocation14 + $0x140] ss:$16 sps:$4 sm:$0xff]  }
  0xfa   :  { %803 = vmatpush2.bf16.msra.mxu0 %v2844_v22  ;;  %844 = vmatpush2.bf16.msra.mxu1 %v2845_v20  ;;  %v2863_v22 = vld [vmem:[#allocation14 + $0x148] ss:$16 sps:$4 sm:$0xff]   ;;  %v2866_v20 = vld [vmem:[#allocation14 + $0x12c] ss:$16 sps:$4 sm:$0xff]  }
  0xfb   :  { %804 = vmatprep.subr.bf16.mxu0 %v2846_v21  ;;  %845 = vmatprep.subr.bf16.mxu1 %v2848_v18  ;;  %v2868_v21 = vld [vmem:[#allocation14 + $0x120] ss:$16 sps:$4 sm:$0xff]   ;;  %v2869_v18 = vld [vmem:[#allocation14 + $0x128] ss:$16 sps:$4 sm:$0xff]  }
  0xfe   :  { %805 = vmatpush2.bf16.msra.mxu0 %v2850_v23  ;;  %846 = vmatpush2.bf16.msra.mxu1 %v2851_v46  ;;  %v2872_v23 = vld [vmem:[#allocation14 + $0x10c] ss:$16 sps:$4 sm:$0xff]   ;;  %v2874_v46 = vld [vmem:[#allocation14 + $0x100] ss:$16 sps:$4 sm:$0xff]  }
  0xff   :  { %806 = vmatprep.subr.bf16.mxu0 %v2852_v61  ;;  %847 = vmatprep.subr.bf16.mxu1 %v2854_v63  ;;  %v2875_v61 = vld [vmem:[#allocation14 + $0x108] ss:$16 sps:$4 sm:$0xff]  }
 0x100   :  { %v2876_v63 = vld [vmem:[#allocation17 + $0x38] sm:$0xff]  }
 0x102   :  { %807 = vmatpush2.bf16.msra.mxu0 %v2856_v19  ;;  %848 = vmatpush2.bf16.msra.mxu1 %v2857_v30  ;;  %v439_v19 = vpack.c.bf16 %v244_v62, %v244_v62  ;;  %v2884_v30 = vld [vmem:[#allocation5] sm:$0xff]   ;;  %v2890_v62 = vld [vmem:[#allocation5 + $0x30] sm:$0xff]  }
 0x103   :  { %808 = vmatprep.subr.bf16.mxu0 %v2858_v26  ;;  %849 = vmatprep.subr.bf16.mxu1 %v2860_v44  ;;  %v2877_v26 = vld [vmem:[#allocation17 + $0x30] sm:$0xff]   ;;  %v2879_v44 = vld [vmem:[#allocation17 + $0x20] sm:$0xff]  }
 0x106   :  { %809 = vmatpush2.bf16.msra.mxu0 %v2862_v45  ;;  %850 = vmatpush2.bf16.msra.mxu1 %v2863_v22  ;;  %v2880_v45 = vld [vmem:[#allocation17 + $0x18] sm:$0xff]   ;;  %v2882_v22 = vld [vmem:[#allocation17 + $0x8] sm:$0xff]  }
 0x107   :  { %810 = vmatprep.subr.bf16.mxu0 %v2864_v47  ;;  %851 = vmatprep.subr.bf16.mxu1 %v2866_v20  ;;  %v2878_v47 = vld [vmem:[#allocation17 + $0x28] sm:$0xff]   ;;  %v2883_v20 = vld [vmem:[#allocation17] sm:$0xff]  }
 0x10a   :  { %811 = vmatpush2.bf16.msra.mxu0 %v2868_v21  ;;  %852 = vmatpush2.bf16.msra.mxu1 %v2869_v18  ;;  %v2885_v21 = vld [vmem:[#allocation5 + $0x8] sm:$0xff]   ;;  %v2886_v18 = vld [vmem:[#allocation5 + $0x10] sm:$0xff]  }
 0x10b   :  { %812 = vmatprep.subr.bf16.mxu0 %v2870_v48  ;;  %853 = vmatprep.subr.bf16.mxu1 %v2872_v23  ;;  %v2881_v48 = vld [vmem:[#allocation17 + $0x10] sm:$0xff]   ;;  %v2887_v23 = vld [vmem:[#allocation5 + $0x18] sm:$0xff]  }
 0x10e   :  { %813 = vmatpush2.bf16.msra.mxu0 %v2874_v46  ;;  %854 = vmatpush2.bf16.msra.mxu1 %v2875_v61  ;;  %v2888_v46 = vld [vmem:[#allocation5 + $0x20] sm:$0xff]   ;;  %v2889_v61 = vld [vmem:[#allocation5 + $0x28] sm:$0xff]  }
 0x10f   :  { %2617 = vmatprep.subr.bf16.mxu1 %v2876_v63 }
 0x111   :  { %815 = vmatmul.mubr.bf16.vlgmr.msra.gmra.mxu0 %v439_v19  ;;  %856 = vmatmul.mubr.bf16.vlgmr.msra.gmra.mxu1 %v439_v19  ;;  %v442_v19 = vlaneseq }
 0x112   :  { %2618 = vmatpush3.bf16.msra.mxu1 %v2876_v63  ;;  %2633 = vmatprep.mubr.bf16.mxu1 %v2884_v30  ;;  %v2891_v63 = vld [vmem:[#allocation5 + $0x38] sm:$0xff]  }
 0x113   :  { %2619 = vmatprep.subr.bf16.mxu1 %v2877_v26  ;;  %v3823_v30 = vand.u32 127, %v442_v19 }
 0x115   :  { %vm886_vm8 = vcmp.lt.s32.totalorder %v3823_v30, 64  ;;  %vm1381_vm9 = vcmp.lt.s32.totalorder %v3823_v30, 10 }
 0x116   :  { %2620 = vmatpush3.bf16.msra.mxu1 %v2877_v26 }
 0x117   :  { %2621 = vmatprep.subr.bf16.mxu1 %v2878_v47 }
 0x11a   :  { %2622 = vmatpush3.bf16.msra.mxu1 %v2878_v47  ;;  %v2892_v47 = vld [vmem:[#allocation16 + $0x38] sm:$0xff]  }
 0x11b   :  { %2623 = vmatprep.subr.bf16.mxu1 %v2879_v44 }
 0x11e   :  { %2624 = vmatpush3.bf16.msra.mxu1 %v2879_v44  ;;  %v3461_v44 = vmov 0.0  }
 0x11f   :  { %2625 = vmatprep.subr.bf16.mxu1 %v2880_v45  ;;  %2597 = vmatprep.subr.bf16.mxu0 %v3461_v44 }
 0x120   :  { %2598 = vmatpush3.bf16.msra.mxu0 %v2892_v47  ;;  %2613 = vmatprep.mubr.msk.bf16.mxu0 %vm3462_vm0, %v3461_v44 }
 0x121   :  { %2599 = vmatprep.subr.bf16.mxu0 %v3461_v44 }
 0x122   :  { %2626 = vmatpush3.bf16.msra.mxu1 %v2880_v45  ;;  %v2893_v45 = vld [vmem:[#allocation16 + $0x30] sm:$0xff]  }
 0x123   :  { %2627 = vmatprep.subr.bf16.mxu1 %v2881_v48 }
 0x124   :  { %2600 = vmatpush3.bf16.msra.mxu0 %v2893_v45 }
 0x125   :  { %2601 = vmatprep.subr.bf16.mxu0 %v3461_v44 }
 0x126   :  { %2628 = vmatpush3.bf16.msra.mxu1 %v2881_v48  ;;  %v2894_v48 = vld [vmem:[#allocation16 + $0x28] sm:$0xff]  }
 0x127   :  { %2629 = vmatprep.subr.bf16.mxu1 %v2882_v22 }
 0x128   :  { %2602 = vmatpush3.bf16.msra.mxu0 %v2894_v48 }
 0x129   :  { %2603 = vmatprep.subr.bf16.mxu0 %v3461_v44 }
 0x12a   :  { %2630 = vmatpush3.bf16.msra.mxu1 %v2882_v22  ;;  %v2895_v22 = vld [vmem:[#allocation16 + $0x20] sm:$0xff]  }
 0x12b   :  { %2631 = vmatprep.subr.bf16.mxu1 %v2883_v20 }
 0x12c   :  { %2604 = vmatpush3.bf16.msra.mxu0 %v2895_v22 }
 0x12d   :  { %2605 = vmatprep.subr.bf16.mxu0 %v3461_v44 }
 0x12e   :  { %2632 = vmatpush3.bf16.msra.mxu1 %v2883_v20  ;;  %v2896_v20 = vld [vmem:[#allocation16 + $0x18] sm:$0xff]  }
 0x130   :  { %2606 = vmatpush3.bf16.msra.mxu0 %v2896_v20 }
 0x131   :  { %2634 = vmatmul.mubr.bf16.vlgmr.msra.gmra.mxu1 %v2885_v21  ;;  %2607 = vmatprep.subr.bf16.mxu0 %v3461_v44  ;;  %v2897_v21 = vld [vmem:[#allocation16 + $0x10] sm:$0xff]  }
 0x132   :  { %2637 = vmatprep.mubr.bf16.mxu1 %v2886_v18  ;;  %v2898_v18 = vld [vmem:[#allocation16 + $0x8] sm:$0xff]  }
 0x134   :  { %2608 = vmatpush3.bf16.msra.mxu0 %v2897_v21 }
 0x135   :  { %2609 = vmatprep.subr.bf16.mxu0 %v3461_v44 }
 0x138   :  { %2610 = vmatpush3.bf16.msra.mxu0 %v2898_v18 }
 0x139   :  { %2638 = vmatmul.mubr.bf16.gmra.mxu1 %v2887_v23  ;;  %2611 = vmatprep.subr.bf16.mxu0 %v3461_v44  ;;  %v2899_v23 = vld [vmem:[#allocation16] sm:$0xff]  }
 0x13a   :  { %2641 = vmatprep.mubr.bf16.mxu1 %v2888_v46  ;;  %v3826_v46 = vshrl.u32 %v442_v19, 7 }
 0x13c   :  { %2612 = vmatpush3.bf16.msra.mxu0 %v2899_v23  ;;  %v4212_v47 = vsub.s32 1, %v3826_v46 }
 0x141   :  { %2642 = vmatmul.mubr.bf16.gmra.mxu1 %v2889_v61  ;;  %v4211_v61 = vsub.s32 0, %v3826_v46 }
 0x142   :  { %2645 = vmatprep.mubr.bf16.mxu1 %v2890_v62  ;;  %v353_v62 = vld [vmem:[%s4173_s9] sm:$0xf] }
 0x143   :  { %v449_v19 = vrot.slane %v353_v62, %v4212_v47 }
 0x149   :  { %2646 = vmatmul.mubr.bf16.gmra.mxu1 %v2891_v63  ;;  %v445_v63 = vrot.slane %v353_v62, %v4211_v61 }
 0x1d1   :  { %v816_v45 = vpop.f32.mrf.mxu0  ;;  %v857_v22 = vpop.f32.mrf.mxu1 }
 0x1d2   :  { %v817_v48 = vadd.f32 %v816_v45, %v445_v63  ;;  %v456_v63 = vsub.s32 3, %v3826_v46  ;;  %v452_v45 = vsub.s32 2, %v3826_v46 }
 0x1d3   :  { %v818_v20 = vpop.f32.mrf.mxu0  ;;  %v859_v44 = vpop.f32.mrf.mxu1 }
 0x1d4   :  { %v2469_v21 = vmul.f32 -1.442695, %v817_v48  ;;  %v819_v49 = vadd.f32 %v818_v20, %v449_v19  ;;  %v457_v53 = vrot.slane %v353_v62, %v456_v63  ;;  %v453_v54 = vrot.slane %v353_v62, %v452_v45 }
 0x1d5   :  { %v820_v18 = vpop.f32.mrf.mxu0  ;;  %v861_v23 = vpop.f32.mrf.mxu1 }
 0x1d6   :  { %2900 = vpow2.f32 %v2469_v21  ;;  %v2470_v51 = vmul.f32 -1.442695, %v819_v49  ;;  %v860_v55 = vadd.f32 %v859_v44, %v457_v53  ;;  %v858_v23 = vadd.f32 %v857_v22, %v453_v54  ;;  %v3842_v49 = vld [vmem:[%s4177_s13] ss:$0 sm:$0xff] }
 0x1d7   :  { %v821_v26 = vpop.f32.mrf.mxu0  ;;  %v862_v50 = vpop.f32.mrf.mxu1 }
 0x1d8   :  { %2902 = vpow2.f32 %v2470_v51 }
 0x1e3   :  { %v2901_v61 = vpop.eup %2900 }
 0x1e4   :  { %v867_v52 = vadd.f32 1.0, %v2901_v61 }
 0x1e5   :  { %v2903_v48 = vpop.eup %2902 }
 0x1e6   :  { %2904 = vrcp.f32 %v867_v52  ;;  %v873_v47 = vadd.f32 1.0, %v2903_v48 }
 0x1e8   :  { %2906 = vrcp.f32 %v873_v47 }
 0x1f1   :  { %v2635_v18 = vpop.f32.mrf.mxu1 }
 0x1f2   :  { %v1128_v61 = vadd.f32 %v2635_v18, %v3842_v49 }
 0x1f3   :  { %v2905_v21 = vpop.eup %2904  ;;  %v1119_v50 = vpop.f32.mrf.mxu1 }
 0x1f4   :  { %v876_v26 = vmul.f32 %v2905_v21, %v860_v55  ;;  %v1120_v62 = vadd.f32 %v3842_v49, %v1119_v50 }
 0x1f5   :  { %v2636_v52 = vpop.f32.mrf.mxu1  ;;  %v2907_v63 = vpop.eup %2906 }
 0x1f6   :  { %v877_v51 = vadd.f32 %v876_v26, %v858_v23  ;;  %v1131_v54 = vadd.f32 %v2636_v52, %v3842_v49  ;;  %v879_v21 = vsub.f32 1.0, %v2907_v63 }
 0x1f7   :  { %v1122_v20 = vpop.f32.mrf.mxu1 }
 0x1f8   :  { %2908 = vtanh.f32 %v877_v51  ;;  %v1123_v55 = vadd.f32 %v3842_v49, %v1122_v20  ;;  %v881_v51 = vmul.f32 %v2907_v63, %v3819_v60 }
 0x1f9   :  { %v2639_v53 = vpop.f32.mrf.mxu1  ;;  %2910 = vtanh.f32 %v1128_v61 }
 0x1fa   :  { %2912 = vtanh.f32 %v1120_v62  ;;  %v1144_v22 = vadd.f32 %v2639_v53, %v3842_v49 }
 0x1fb   :  { %v1135_v47 = vpop.f32.mrf.mxu1  ;;  %2914 = vtanh.f32 %v1131_v54 }
 0x1fc   :  { %2916 = vtanh.f32 %v1123_v55  ;;  %v1136_v45 = vadd.f32 %v3842_v49, %v1135_v47 }
 0x1fd   :  { %v2640_v19 = vpop.f32.mrf.mxu1  ;;  %2918 = vtanh.f32 %v1144_v22 }
 0x1ff   :  { %v1138_v44 = vpop.f32.mrf.mxu1 }
 0x200   :  { %v1139_v23 = vadd.f32 %v3842_v49, %v1138_v44 }
 0x201   :  { %v2643_v48 = vpop.f32.mrf.mxu1 }
 0x202   :  { %v1160_v18 = vadd.f32 %v2643_v48, %v3842_v49 }
 0x203   :  { %v1151_v26 = vpop.f32.mrf.mxu1 }
 0x204   :  { %2920 = vtanh.f32 %v1160_v18  ;;  %v1152_v22 = vadd.f32 %v3842_v49, %v1151_v26 }
 0x205   :  { %v2909_v50 = vpop.eup %2908  ;;  %2922 = vtanh.f32 %v1136_v45  ;;  %v2644_v61 = vpop.f32.mrf.mxu1 }
 0x206   :  { %v880_v52 = vmul.f32 %v2909_v50, %v879_v21  ;;  %v1163_v62 = vadd.f32 %v2644_v61, %v3842_v49  ;;  %v2911_v20 = vpop.eup %2910  ;;  %2924 = vtanh.f32 %v1139_v23  ;;  %v1147_v50 = vadd.f32 %v2640_v19, %v3842_v49 }
 0x207   :  { %v1154_v54 = vpop.f32.mrf.mxu1  ;;  %v2913_v55 = vpop.eup %2912 }
 0x208   :  { %v3854_v53 = vadd.f32 %v881_v51, %v880_v52  ;;  %2926 = vtanh.f32 %v1163_v62  ;;  %v1155_v47 = vadd.f32 %v3842_v49, %v1154_v54  ;;  %v2915_v45 = vpop.eup %2914 }
 0x209   :  { %v2647_v44 = vpop.f32.mrf.mxu1  ;;  %v2917_v21 = vpop.eup %2916 }
 0x20a   :  { %v1200_v48 = vmul.f32 %v2911_v20, %v3854_v53  ;;  %v1198_v60 = vmul.f32 %v2913_v55, %v3854_v53  ;;  %v883_v63 = vpack.c.bf16 %v3854_v53, %v3854_v53  ;;  %2928 = vtanh.f32 %v1155_v47  ;;  %v2919_v61 = vpop.eup %2918 }
 0x20b   :  { %v1167_v18 = vpop.f32.mrf.mxu1  ;;  %2930 = vtanh.f32 %v1152_v22  ;;  %v1201_v51 = vmul.f32 %v2915_v45, %v3854_v53  ;;  %v1199_v52 = vmul.f32 %v2917_v21, %v3854_v53  ;;  %v1176_v55 = vadd.f32 %v2647_v44, %v3842_v49 }
 0x20c   :  { %1218 = vadd.xlane.f32.xlu1 %v1200_v48  ;;  %1214 = vadd.xlane.f32.xlu0 %v1198_v60  ;;  %v1168_v23 = vadd.f32 %v3842_v49, %v1167_v18  ;;  %v1204_v47 = vmul.f32 %v2919_v61, %v3854_v53 }
 0x20d   :  { %2614 = vmatmul.mubr.bf16.vlgmr.msra.gmra.mxu0 %v883_v63  ;;  %v2648_v26 = vpop.f32.mrf.mxu1 }
 0x20e   :  { %2932 = vtanh.f32 %v1168_v23  ;;  %v1179_v22 = vadd.f32 %v2648_v26, %v3842_v49 }
 0x20f   :  { %v1170_v62 = vpop.f32.mrf.mxu1  ;;  %2934 = vtanh.f32 %v1147_v50 }
 0x210   :  { %1220 = vadd.xlane.f32.xlu1 %v1201_v51  ;;  %1216 = vadd.xlane.f32.xlu0 %v1199_v52  ;;  %v1171_v20 = vadd.f32 %v3842_v49, %v1170_v62 }
 0x211   :  { %v2921_v54 = vpop.eup %2920 }
 0x212   :  { %v2923_v19 = vpop.eup %2922  ;;  %2936 = vtanh.f32 %v1171_v20  ;;  %v1208_v48 = vmul.f32 %v2921_v54, %v3854_v53 }
 0x213   :  { %v2925_v60 = vpop.eup %2924  ;;  %2938 = vtanh.f32 %v1176_v55  ;;  %v1202_v45 = vmul.f32 %v2923_v19, %v3854_v53 }
 0x214   :  { %1226 = vadd.xlane.f32.xlu0 %v1204_v47  ;;  %1234 = vadd.xlane.f32.xlu1 %v1208_v48  ;;  %2940 = vtanh.f32 %v1179_v22  ;;  %v1203_v44 = vmul.f32 %v2925_v60, %v3854_v53 }
 0x215   :  { %v2927_v63 = vpop.eup %2926 }
 0x216   :  { %v1209_v18 = vmul.f32 %v2927_v63, %v3854_v53 }
 0x217   :  { %v2929_v21 = vpop.eup %2928 }
 0x218   :  { %1222 = vadd.xlane.f32.xlu0 %v1202_v45  ;;  %1236 = vadd.xlane.f32.xlu1 %v1209_v18  ;;  %v2931_v23 = vpop.eup %2930  ;;  %v1207_v49 = vmul.f32 %v2929_v21, %v3854_v53  ;;  %v3883_v18 = vsub.s32 %v3823_v30, %v3826_v46 }
 0x219   :  { %v1206_v26 = vmul.f32 %v2931_v23, %v3854_v53 }
 0x21b   :  { %v2933_v50 = vpop.eup %2932 }
 0x21c   :  { %1224 = vadd.xlane.f32.xlu0 %v1203_v44  ;;  %1232 = vadd.xlane.f32.xlu1 %v1207_v49  ;;  %v2935_v51 = vpop.eup %2934  ;;  %v1210_v52 = vmul.f32 %v2933_v50, %v3854_v53 }
 0x21d   :  { %v1205_v62 = vmul.f32 %v2935_v51, %v3854_v53 }
 0x21f   :  { %v2937_v61 = vpop.eup %2936 }
 0x220   :  { %1230 = vadd.xlane.f32.xlu0 %v1206_v26  ;;  %1238 = vadd.xlane.f32.xlu1 %v1210_v52  ;;  %v2939_v20 = vpop.eup %2938  ;;  %v1211_v54 = vmul.f32 %v2937_v61, %v3854_v53 }
 0x221   :  { %v2941_v55 = vpop.eup %2940  ;;  %v1212_v47 = vmul.f32 %v2939_v20, %v3854_v53 }
 0x222   :  { %v1213_v19 = vmul.f32 %v2941_v55, %v3854_v53 }
 0x224   :  { %1228 = vadd.xlane.f32.xlu0 %v1205_v62  ;;  %1240 = vadd.xlane.f32.xlu1 %v1211_v54 }
 0x228   :  { %1242 = vadd.xlane.f32.xlu0 %v1212_v47  ;;  %1244 = vadd.xlane.f32.xlu1 %v1213_v19 }
 0x295   :  { %v1219_v22 = vpop.xlane.xlu1 %1218  ;;  %v1215_v48 = vpop.xlane.xlu0 %1214 }
 0x296   :  { %v1265_v49 = vrot.slane %v1215_v48, %v3883_v18  ;;  %v1273_v51 = vrot.slane %v1219_v22, %v3883_v18 }
 0x299   :  { %v1221_v60 = vpop.xlane.xlu1 %1220  ;;  %v1217_v63 = vpop.xlane.xlu0 %1216 }
 0x29a   :  { %v1269_v44 = vrot.slane %v1217_v63, %v3883_v18  ;;  %v1277_v54 = vrot.slane %v1221_v60, %v3883_v18 }
 0x29c   :  { %v1327_v26 = vsel %vm1326_vm1, %v1269_v44, %v1265_v49 }
 0x29d   :  { %v1227_v45 = vpop.xlane.xlu0 %1226  ;;  %v1235_v21 = vpop.xlane.xlu1 %1234  ;;  %v1329_v62 = vsel %vm1328_vm2, %v1273_v51, %v1327_v26 }
 0x29e   :  { %v1331_v19 = vsel %vm1330_vm3, %v1277_v54, %v1329_v62  ;;  %v1305_v44 = vrot.slane %v1235_v21, %v3883_v18  ;;  %v1289_v51 = vrot.slane %v1227_v45, %v3883_v18 }
 0x2a1   :  { %v1223_v23 = vpop.xlane.xlu0 %1222  ;;  %v1237_v50 = vpop.xlane.xlu1 %1236 }
 0x2a2   :  { %v1281_v20 = vrot.slane %v1223_v23, %v3883_v18  ;;  %v1309_v23 = vrot.slane %v1237_v50, %v3883_v18 }
 0x2a4   :  { %v1333_v49 = vsel %vm1332_vm4, %v1281_v20, %v1331_v19 }
 0x2a5   :  { %v1225_v52 = vpop.xlane.xlu0 %1224  ;;  %v1233_v61 = vpop.xlane.xlu1 %1232 }
 0x2a6   :  { %v1285_v55 = vrot.slane %v1225_v52, %v3883_v18  ;;  %v1301_v48 = vrot.slane %v1233_v61, %v3883_v18 }
 0x2a8   :  { %v1335_v26 = vsel %vm1334_vm5, %v1285_v55, %v1333_v49 }
 0x2a9   :  { %v1231_v47 = vpop.xlane.xlu0 %1230  ;;  %v1239_v63 = vpop.xlane.xlu1 %1238 }
 0x2aa   :  { %v1297_v22 = vrot.slane %v1231_v47, %v3883_v18  ;;  %v1313_v61 = vrot.slane %v1239_v63, %v3883_v18  ;;  %v1337_v47 = vsel %vm1336_vm6, %v1289_v51, %v1335_v26 }
 0x2ac   :  { %v1340_v60 = vsel %vm1326_vm1, %v1301_v48, %v1297_v22 }
 0x2ad   :  { %v1341_v52 = vsel %vm1328_vm2, %v1305_v44, %v1340_v60  ;;  %v1229_v62 = vpop.xlane.xlu0 %1228  ;;  %v1241_v54 = vpop.xlane.xlu1 %1240  ;;  %v2471_v60 = vld [vmem:[%s4175_s11] ss:$0 sm:$0xff]  ;;  %s3422_s11 = smov 0  }
 0x2ae   :  { %v1342_v21 = vsel %vm1330_vm3, %v1309_v23, %v1341_v52  ;;  %v1293_v20 = vrot.slane %v1229_v62, %v3883_v18  ;;  %v1317_v50 = vrot.slane %v1241_v54, %v3883_v18 }
 0x2af   :  { %v1343_v55 = vsel %vm1332_vm4, %v1313_v61, %v1342_v21 }
 0x2b0   :  { %v1339_v19 = vsel %vm1338_vm7, %v1293_v20, %v1337_v47  ;;  %v1344_v63 = vsel %vm1334_vm5, %v1317_v50, %v1343_v55 }
 0x2b1   :  { %1349 = vxpose.xlu0.b32.start [1/2] (short) (narrow) %v1339_v19, 8  ;;  %v1243_v45 = vpop.xlane.xlu0 %1242  ;;  %v1245_v48 = vpop.xlane.xlu1 %1244 }
 0x2b2   :  { %v1321_v22 = vrot.slane %v1243_v45, %v3883_v18  ;;  %v1325_v44 = vrot.slane %v1245_v48, %v3883_v18 }
 0x2b4   :  { %v1345_v49 = vsel %vm1336_vm6, %v1321_v22, %v1344_v63  ;;  %v3418_v63 = vmov 0.0  }
 0x2b5   :  { %v1346_v23 = vsel %vm1338_vm7, %v1325_v44, %v1345_v49 }
 0x2b6   :  { %1350 = vxpose.xlu0.b32.end [2/2] (short) (narrow) %v1346_v23, 8 }
 0x2cd   :  { %v976_v26 = vpop.f32.mrf.mxu0 }
 0x2ce   :  { %v977_v51 = vadd.f32 %v2471_v60, %v976_v26 }
 0x2cf   :  { %v2615_v52 = vpop.f32.mrf.mxu0 }
 0x2d0   :  { %v3921_v62 = vsel %vm886_vm8, %v977_v51, -1e+30 }
 0x2d1   :  { %v979_v61 = vpop.f32.mrf.mxu0 }
 0x2d3   :  { %v2616_v54 = vpop.f32.mrf.mxu0 }
 0x32e   :  { %v1365_v21 = vpop.trf.xlu0 }
 0x32f   :  { %v1382_v20 = vsel %vm1381_vm9, %v1365_v21, -1e+30 }
 0x330   :  { %v1384_v50 = vsel %vm1383_vm10, %v1382_v20, -inf }
 0x331   :  { %1385 = vmax.xlane.f32.xlu1 %v1384_v50 }
 0x3ba   :  { %v1386_v47 = vpop.xlane.xlu1 %1385 }
 0x3bb   :  { %v1387_v55 = vsub.f32 %v1382_v20, %v1386_v47 }
 0x3bd   :  { %v1388_v19 = vmul.f32 1.442695, %v1387_v55 }
 0x3bf   :  { %2942 = vpow2.f32 %v1388_v19 }
 0x3cc   :  { %v2943_v45 = vpop.eup %2942 }
 0x3cd   :  { %v1390_v48 = vsel %vm1383_vm10, %v2943_v45, 0.0 }
 0x3ce   :  { %1391 = vadd.xlane.f32.xlu1 %v1390_v48 }
 0x457   :  { %v1392_v22 = vpop.xlane.xlu1 %1391 }
 0x458 LB: > { %v1401_v44 = vstv %s3424_s11  ;;  %v4271_v49 = vcvt.s32.f32 %v3708_v24  ;;  %v4272_v61 = vcvt.s32.f32 %v3823_v30  ;;  %s1399_s11 = sadd.s32 1, %s3424_s11   ;;  %s3424_s11 = sphi %s3422_s11, %s1399_s11   ;;  %v3420_v63 = vphi %v3418_v63, %v3419_v63  }
 0x459   : > { %vm1402_vm11 = vcmp.eq.s32.totalorder %v3823_v30, %v1401_v44  ;;  %p1396_p9 = scmp.ge.s32.totalorder %s1399_s11, 16  }
 0x45a   : > { %v1407_v23 = vsel %vm1402_vm11, %v4271_v49, 0.0  ;;  %v1403_v60 = vsel %vm1402_vm11, %v2943_v45, 0.0  ;;  %v1418_v50 = vmul.f32 (%p1396_p9), 1e-10, %v1392_v22  ;;  %v2513_v55 = vcombine.low (%p1396_p9), %v3746_v42, %v3748_v43 }
 0x45b   : > { %v1408_v26 = vsel %vm1383_vm10, %v1407_v23, 0.0  ;;  %v1404_v51 = vsel %vm1383_vm10, %v1403_v60, 0.0  ;;  %v2512_v19 = vcombine.low (%p1396_p9), %v3742_v40, %v3744_v41  ;;  %v2498_v44 = vcombine.low (%p1396_p9), %v3660_v0, %v3662_v1 }
 0x45c   : > { %1409 = vadd.xlane.f32.xlu0 %v1408_v26  ;;  %2649 = vmatprep.subr.bf16.mxu0 (%p1396_p9), %v2513_v55  ;;  %v2510_v24 = vcombine.low (%p1396_p9), %v3734_v36, %v3736_v37  ;;  %v2509_v40 = vcombine.low (%p1396_p9), %v3730_v34, %v3732_v35  ;;  %v2508_v0 = vcombine.low (%p1396_p9), %v3726_v32, %v3728_v33  ;;  %vm1815_vm15 = vcmp.lt.s32.totalorder (%p1396_p9), %v3823_v30, 12 }
 0x45d   :  { %2650 = vmatpush3.bf16.msra.mxu0 (%p1396_p9), %v2513_v55  ;;  %2665 = vmatprep.mubr.bf16.mxu0 (%p1396_p9), %v2498_v44  ;;  %v2506_v34 = vcombine.low (%p1396_p9), %v3717_v27, %v3719_v28  ;;  %v2499_v32 = vcombine.low (%p1396_p9), %v3664_v2, %v3666_v3  ;;  %v2500_v33 = vcombine.low (%p1396_p9), %v3668_v4, %v3670_v5  ;;  %v3972_v4 = vld [vmem:[%s4179_s15] ss:$0 sm:$0xff] (%p1396_p9)  ;;  %s3430_s15 = smov (%p1396_p9), 0  }
 0x45e   :  { %2651 = vmatprep.subr.bf16.mxu0 (%p1396_p9), %v2512_v19  ;;  %v2503_v27 = vcombine.low (%p1396_p9), %v3680_v10, %v3682_v11  ;;  %v2504_v2 = vcombine.low (%p1396_p9), %v3684_v12, %v3686_v13  ;;  %v2505_v3 = vcombine.low (%p1396_p9), %v3688_v14, %v3690_v15 }
 0x460   : > { %1405 = vadd.xlane.f32.xlu0 %v1404_v51 }
 0x461   :  { %2652 = vmatpush3.bf16.msra.mxu0 (%p1396_p9), %v2512_v19 }
 0x4e5   : > { %v1410_v52 = vpop.xlane.xlu0 %1409 }
 0x4e6   : > { %vm1411_vm12 = vcmp.eq.f32.partialorder %v4272_v61, %v1410_v52  ;;  %vm1412_vm13 = vcmp.gt.f32.partialorder %v1410_v52, 0.0 }
 0x4e7   : > { %vm1415_vm14 = vmand %vm1411_vm12, %vm1412_vm13 }
 0x4e9   : > { %v1406_v54 = vpop.xlane.xlu0 %1405  ;;  %1398 = sbr.rel (!%p1396_p9) target bundleno = 1112 (0x458), region = 206 }
 0x4ea   : > { %v1416_v21 = vsel %vm1415_vm14, %v1406_v54, 0.0 }
 0x4eb   : > { %v1417_v20 = vadd.f32 %v3420_v63, %v1416_v21  }
 0x4ed   : > { %v3419_v63 = vmov %v1417_v20   ;;  %v1419_v48 = vadd.f32 (%p1396_p9), %v1418_v50, %v1417_v20 }
 0x4ee   :  { %v2511_v63 = vcombine.low %v3738_v38, %v3740_v39  ;;  %v2507_v39 = vcombine.low %v3721_v29, %v3724_v31  ;;  %v2501_v29 = vcombine.low %v3672_v6, %v3674_v7  ;;  %v2502_v31 = vcombine.low %v3676_v8, %v3678_v9 }
 0x4ef   :  { %2944 = vlog2.f32 %v1419_v48 }
 0x4f0   :  { %2653 = vmatprep.subr.bf16.mxu0 %v2511_v63 }
 0x4f1   :  { %2654 = vmatpush3.bf16.msra.mxu0 %v2511_v63 }
 0x4f2   :  { %2655 = vmatprep.subr.bf16.mxu0 %v2510_v24 }
 0x4f5   :  { %2656 = vmatpush3.bf16.msra.mxu0 %v2510_v24 }
 0x4f6   :  { %2657 = vmatprep.subr.bf16.mxu0 %v2509_v40 }
 0x4f9   :  { %2658 = vmatpush3.bf16.msra.mxu0 %v2509_v40 }
 0x4fa   :  { %2659 = vmatprep.subr.bf16.mxu0 %v2508_v0 }
 0x4fc   :  { %v2945_v1 = vpop.eup %2944 }
 0x4fd   :  { %v1421_v41 = vmul.f32 0.6931472, %v2945_v1  ;;  %2660 = vmatpush3.bf16.msra.mxu0 %v2508_v0 }
 0x4fe   :  { %2661 = vmatprep.subr.bf16.mxu0 %v2507_v39 }
 0x4ff   :  { %v1422_v38 = vadd.f32 %v1421_v41, %v1386_v47 }
 0x501   :  { %v3951_v36 = vsel %vm886_vm8, %v1422_v38, -1e+30  ;;  %2662 = vmatpush3.bf16.msra.mxu0 %v2507_v39 }
 0x502   :  { %2663 = vmatprep.subr.bf16.mxu0 %v2506_v34 }
 0x505   :  { %2664 = vmatpush3.bf16.msra.mxu0 %v2506_v34 }
 0x508   :  { %2666 = vmatmul.mubr.bf16.vlgmr.msra.gmra.mxu0 %v2499_v32 }
 0x509   :  { %2669 = vmatprep.mubr.bf16.mxu0 %v2500_v33 }
 0x510   :  { %2670 = vmatmul.mubr.bf16.gmra.mxu0 %v2501_v29 }
 0x511   :  { %2673 = vmatprep.mubr.bf16.mxu0 %v2502_v31 }
 0x518   :  { %2674 = vmatmul.mubr.bf16.gmra.mxu0 %v2503_v27 }
 0x519   :  { %2677 = vmatprep.mubr.bf16.mxu0 %v2504_v2 }
 0x520   :  { %2678 = vmatmul.mubr.bf16.gmra.mxu0 %v2505_v3 }
 0x5c8   :  { %v2667_v5 = vpop.f32.mrf.mxu0 }
 0x5c9   :  { %v1569_v6 = vadd.f32 %v2667_v5, %v3972_v4 }
 0x5ca   :  { %v1560_v7 = vpop.f32.mrf.mxu0 }
 0x5cb   :  { %2946 = vtanh.f32 %v1569_v6  ;;  %v1561_v8 = vadd.f32 %v3972_v4, %v1560_v7 }
 0x5cc   :  { %v2668_v9 = vpop.f32.mrf.mxu0 }
 0x5cd   :  { %2948 = vtanh.f32 %v1561_v8  ;;  %v1572_v10 = vadd.f32 %v2668_v9, %v3972_v4 }
 0x5ce   :  { %v1563_v11 = vpop.f32.mrf.mxu0 }
 0x5cf   :  { %2950 = vtanh.f32 %v1572_v10  ;;  %v1564_v12 = vadd.f32 %v3972_v4, %v1563_v11 }
 0x5d0   :  { %v2671_v13 = vpop.f32.mrf.mxu0 }
 0x5d1   :  { %2952 = vtanh.f32 %v1564_v12  ;;  %v1585_v14 = vadd.f32 %v2671_v13, %v3972_v4 }
 0x5d2   :  { %v1576_v15 = vpop.f32.mrf.mxu0 }
 0x5d3   :  { %2954 = vtanh.f32 %v1585_v14  ;;  %v1577_v28 = vadd.f32 %v3972_v4, %v1576_v15 }
 0x5d4   :  { %v2672_v35 = vpop.f32.mrf.mxu0 }
 0x5d5   :  { %2956 = vtanh.f32 %v1577_v28  ;;  %v1588_v50 = vadd.f32 %v2672_v35, %v3972_v4 }
 0x5d6   :  { %v1579_v37 = vpop.f32.mrf.mxu0 }
 0x5d7   :  { %v1580_v42 = vadd.f32 %v3972_v4, %v1579_v37 }
 0x5d8   :  { %v2947_v43 = vpop.eup %2946  ;;  %v2675_v47 = vpop.f32.mrf.mxu0 }
 0x5d9   :  { %v1601_v45 = vadd.f32 %v2675_v47, %v3972_v4  ;;  %v1641_v22 = vmul.f32 %v2947_v43, %v3854_v53  ;;  %2958 = vtanh.f32 %v1580_v42 }
 0x5da   :  { %v2949_v49 = vpop.eup %2948  ;;  %v1592_v23 = vpop.f32.mrf.mxu0 }
 0x5db   :  { %2960 = vtanh.f32 %v1601_v45  ;;  %v1593_v60 = vadd.f32 %v3972_v4, %v1592_v23  ;;  %1659 = vadd.xlane.f32.xlu1 %v1641_v22  ;;  %v1639_v26 = vmul.f32 %v2949_v49, %v3854_v53 }
 0x5dc   :  { %v2951_v51 = vpop.eup %2950  ;;  %v2676_v52 = vpop.f32.mrf.mxu0 }
 0x5dd   :  { %v1604_v61 = vadd.f32 %v2676_v52, %v3972_v4  ;;  %1655 = vadd.xlane.f32.xlu0 %v1639_v26  ;;  %v1642_v54 = vmul.f32 %v2951_v51, %v3854_v53  ;;  %2962 = vtanh.f32 %v1593_v60 }
 0x5de   :  { %v2953_v21 = vpop.eup %2952  ;;  %v1595_v20 = vpop.f32.mrf.mxu0 }
 0x5df   :  { %2964 = vtanh.f32 %v1604_v61  ;;  %v1596_v55 = vadd.f32 %v3972_v4, %v1595_v20  ;;  %1661 = vadd.xlane.f32.xlu1 %v1642_v54  ;;  %v1640_v19 = vmul.f32 %v2953_v21, %v3854_v53 }
 0x5e0   :  { %v2955_v48 = vpop.eup %2954  ;;  %v2679_v44 = vpop.f32.mrf.mxu0 }
 0x5e1   :  { %2966 = vtanh.f32 %v1596_v55  ;;  %1657 = vadd.xlane.f32.xlu0 %v1640_v19  ;;  %v1617_v24 = vadd.f32 %v2679_v44, %v3972_v4  ;;  %v1645_v0 = vmul.f32 %v2955_v48, %v3854_v53 }
 0x5e2   :  { %v1608_v63 = vpop.f32.mrf.mxu0  ;;  %2968 = vtanh.f32 %v1588_v50  ;;  %v2957_v1 = vpop.eup %2956 }
 0x5e3   :  { %v1609_v40 = vadd.f32 %v3972_v4, %v1608_v63  ;;  %v1643_v32 = vmul.f32 %v2957_v1, %v3854_v53 }
 0x5e4   :  { %v2680_v41 = vpop.f32.mrf.mxu0 }
 0x5e5   :  { %2970 = vtanh.f32 %v1609_v40  ;;  %1667 = vadd.xlane.f32.xlu0 %v1645_v0  ;;  %v1620_v29 = vadd.f32 %v2680_v41, %v3972_v4 }
 0x5e6   :  { %v1611_v38 = vpop.f32.mrf.mxu0  ;;  %v2959_v39 = vpop.eup %2958  ;;  %2972 = vtanh.f32 %v1617_v24 }
 0x5e7   :  { %v1612_v34 = vadd.f32 %v3972_v4, %v1611_v38  ;;  %v1644_v2 = vmul.f32 %v2959_v39, %v3854_v53 }
 0x5e8   :  { %v2961_v33 = vpop.eup %2960 }
 0x5e9   :  { %2974 = vtanh.f32 %v1612_v34  ;;  %1663 = vadd.xlane.f32.xlu0 %v1643_v32  ;;  %v1649_v31 = vmul.f32 %v2961_v33, %v3854_v53 }
 0x5ea   :  { %v2963_v27 = vpop.eup %2962  ;;  %2976 = vtanh.f32 %v1620_v29 }
 0x5eb   :  { %1675 = vadd.xlane.f32.xlu1 %v1649_v31  ;;  %v1647_v7 = vmul.f32 %v2963_v27, %v3854_v53 }
 0x5ec   :  { %v2965_v3 = vpop.eup %2964 }
 0x5ed   :  { %1665 = vadd.xlane.f32.xlu0 %v1644_v2  ;;  %v1650_v5 = vmul.f32 %v2965_v3, %v3854_v53 }
 0x5ee   :  { %v2967_v6 = vpop.eup %2966 }
 0x5ef   :  { %1677 = vadd.xlane.f32.xlu1 %v1650_v5  ;;  %v2969_v8 = vpop.eup %2968  ;;  %v1648_v4 = vmul.f32 %v2967_v6, %v3854_v53 }
 0x5f0   :  { %v1646_v10 = vmul.f32 %v2969_v8, %v3854_v53 }
 0x5f1   :  { %1671 = vadd.xlane.f32.xlu0 %v1647_v7 }
 0x5f2   :  { %v2971_v9 = vpop.eup %2970 }
 0x5f3   :  { %1673 = vadd.xlane.f32.xlu1 %v1648_v4  ;;  %v2973_v11 = vpop.eup %2972  ;;  %v1651_v12 = vmul.f32 %v2971_v9, %v3854_v53 }
 0x5f4   :  { %v1653_v14 = vmul.f32 %v2973_v11, %v3854_v53 }
 0x5f5   :  { %1669 = vadd.xlane.f32.xlu0 %v1646_v10 }
 0x5f6   :  { %v2975_v13 = vpop.eup %2974 }
 0x5f7   :  { %1679 = vadd.xlane.f32.xlu1 %v1651_v12  ;;  %v1652_v15 = vmul.f32 %v2975_v13, %v3854_v53  ;;  %v2977_v28 = vpop.eup %2976 }
 0x5f8   :  { %v1654_v35 = vmul.f32 %v2977_v28, %v3854_v53 }
 0x5f9   :  { %1683 = vadd.xlane.f32.xlu0 %v1653_v14 }
 0x5fb   :  { %1681 = vadd.xlane.f32.xlu1 %v1652_v15 }
 0x5ff   :  { %1685 = vadd.xlane.f32.xlu1 %v1654_v35 }
 0x664   :  { %v1660_v42 = vpop.xlane.xlu1 %1659 }
 0x665   :  { %v1714_v51 = vrot.slane %v1660_v42, %v3883_v18 }
 0x666   :  { %v1656_v37 = vpop.xlane.xlu0 %1655 }
 0x667   :  { %v1706_v23 = vrot.slane %v1656_v37, %v3883_v18 }
 0x668   :  { %v1662_v45 = vpop.xlane.xlu1 %1661 }
 0x669   :  { %v1718_v20 = vrot.slane %v1662_v45, %v3883_v18 }
 0x66a   :  { %v1658_v43 = vpop.xlane.xlu0 %1657 }
 0x66b   :  { %v1710_v22 = vrot.slane %v1658_v43, %v3883_v18 }
 0x66d   :  { %v1767_v26 = vsel %vm1326_vm1, %v1710_v22, %v1706_v23  ;;  %v3426_v22 = vmov 0.0  }
 0x66e   :  { %v1668_v47 = vpop.xlane.xlu0 %1667  ;;  %v1768_v61 = vsel %vm1328_vm2, %v1714_v51, %v1767_v26 }
 0x66f   :  { %v1769_v19 = vsel %vm1330_vm3, %v1718_v20, %v1768_v61  ;;  %v1730_v0 = vrot.slane %v1668_v47, %v3883_v18  ;;  %v1826_v47 = vcvt.s32.f32 %v3713_v25 }
 0x672   :  { %v1664_v49 = vpop.xlane.xlu0 %1663 }
 0x673   :  { %v1722_v54 = vrot.slane %v1664_v49, %v3883_v18 }
 0x674   :  { %v1676_v60 = vpop.xlane.xlu1 %1675 }
 0x675   :  { %v1770_v48 = vsel %vm1332_vm4, %v1722_v54, %v1769_v19  ;;  %v1746_v1 = vrot.slane %v1676_v60, %v3883_v18 }
 0x676   :  { %v1666_v52 = vpop.xlane.xlu0 %1665 }
 0x677   :  { %v1726_v50 = vrot.slane %v1666_v52, %v3883_v18 }
 0x678   :  { %v1678_v21 = vpop.xlane.xlu1 %1677 }
 0x679   :  { %v1771_v40 = vsel %vm1334_vm5, %v1726_v50, %v1770_v48  ;;  %v1750_v29 = vrot.slane %v1678_v21, %v3883_v18 }
 0x67a   :  { %v1672_v55 = vpop.xlane.xlu0 %1671  ;;  %v1772_v33 = vsel %vm1336_vm6, %v1730_v0, %v1771_v40 }
 0x67b   :  { %v1738_v63 = vrot.slane %v1672_v55, %v3883_v18 }
 0x67c   :  { %v1674_v44 = vpop.xlane.xlu1 %1673 }
 0x67d   :  { %v1742_v24 = vrot.slane %v1674_v44, %v3883_v18 }
 0x67e   :  { %v1670_v41 = vpop.xlane.xlu0 %1669 }
 0x67f   :  { %v1774_v38 = vsel %vm1326_vm1, %v1742_v24, %v1738_v63  ;;  %v1734_v39 = vrot.slane %v1670_v41, %v3883_v18 }
 0x680   :  { %v1775_v34 = vsel %vm1328_vm2, %v1746_v1, %v1774_v38  ;;  %v1680_v32 = vpop.xlane.xlu1 %1679 }
 0x681   :  { %v1773_v31 = vsel %vm1338_vm7, %v1734_v39, %v1772_v33  ;;  %v1754_v27 = vrot.slane %v1680_v32, %v3883_v18  ;;  %v1776_v2 = vsel %vm1330_vm3, %v1750_v29, %v1775_v34 }
 0x682   :  { %1783 = vxpose.xlu0.b32.start [1/2] (short) (narrow) %v1773_v31, 8  ;;  %v1684_v5 = vpop.xlane.xlu0 %1683 }
 0x683   :  { %v1777_v7 = vsel %vm1332_vm4, %v1754_v27, %v1776_v2  ;;  %v1762_v4 = vrot.slane %v1684_v5, %v3883_v18 }
 0x684   :  { %v1682_v3 = vpop.xlane.xlu1 %1681 }
 0x685   :  { %v1758_v6 = vrot.slane %v1682_v3, %v3883_v18 }
 0x687   :  { %v1778_v8 = vsel %vm1334_vm5, %v1758_v6, %v1777_v7 }
 0x688   :  { %v1686_v9 = vpop.xlane.xlu1 %1685  ;;  %v1779_v11 = vsel %vm1336_vm6, %v1762_v4, %v1778_v8 }
 0x689   :  { %v1766_v10 = vrot.slane %v1686_v9, %v3883_v18 }
 0x68b   :  { %v1780_v12 = vsel %vm1338_vm7, %v1766_v10, %v1779_v11 }
 0x68c   :  { %1784 = vxpose.xlu0.b32.end [2/2] (short) (narrow) %v1780_v12, 8 }
 0x704   :  { %v1799_v13 = vpop.trf.xlu0 }
 0x705   :  { %v1816_v14 = vsel %vm1815_vm15, %v1799_v13, -1e+30 }
 0x706   :  { %v1817_v15 = vsel %vm1383_vm10, %v1816_v14, -inf }
 0x707   :  { %1818 = vmax.xlane.f32.xlu1 %v1817_v15 }
 0x790   :  { %v1819_v28 = vpop.xlane.xlu1 %1818 }
 0x791   :  { %v1820_v35 = vsub.f32 %v1816_v14, %v1819_v28 }
 0x793   :  { %v1821_v37 = vmul.f32 1.442695, %v1820_v35 }
 0x795   :  { %2978 = vpow2.f32 %v1821_v37 }
 0x7a2   :  { %v2979_v42 = vpop.eup %2978 }
 0x7a3   :  { %v1823_v43 = vsel %vm1383_vm10, %v2979_v42, 0.0 }
 0x7a4   :  { %1824 = vadd.xlane.f32.xlu1 %v1823_v43 }
 0x82d   :  { %v1825_v45 = vpop.xlane.xlu1 %1824 }
 0x82e LB: > { %v1834_v49 = vstv %s3432_s15  ;;  %v4273_v25 = vcvt.s32.f32 %v3823_v30  ;;  %s1832_s15 = sadd.s32 1, %s3432_s15   ;;  %s3432_s15 = sphi %s3430_s15, %s1832_s15   ;;  %v3428_v22 = vphi %v3426_v22, %v3427_v22  }
 0x82f   : > { %vm1835_vm0 = vcmp.eq.s32.totalorder %v3823_v30, %v1834_v49  ;;  %p1829_p10 = scmp.ge.s32.totalorder %s1832_s15, 16  }
 0x830   : > { %v1840_v23 = vsel %vm1835_vm0, %v1826_v47, 0.0  ;;  %v1836_v60 = vsel %vm1835_vm0, %v2979_v42, 0.0  ;;  %v1851_v20 = vmul.f32 (%p1829_p10), 1e-10, %v1825_v45  ;;  %v2526_v50 = vcombine.low (%p1829_p10), %v3778_v58, %v3780_v59  ;;  %v4274_v44 = vld [vmem:[#allocation58_spill] sm:$0xff] (%p1829_p10)  ;;  %v4275_v63 = vld [vmem:[#allocation57_spill] sm:$0xff] (%p1829_p10) }
 0x831   : > { %v1841_v26 = vsel %vm1383_vm10, %v1840_v23, 0.0  ;;  %v1837_v51 = vsel %vm1383_vm10, %v1836_v60, 0.0  ;;  %v2525_v55 = vcombine.low (%p1829_p10), %v3774_v56, %v3776_v57  ;;  %v2515_v48 = vcombine.low (%p1829_p10), %v3692_v16, %v3694_v17  ;;  %v4276_v40 = vld [vmem:[#allocation56_spill] sm:$0xff] (%p1829_p10)  ;;  %v4277_v0 = vld [vmem:[#allocation55_spill] sm:$0xff] (%p1829_p10)  ;;  %v4278_v56 = vld [vmem:[#allocation54_spill] sm:$0xff] (%p1829_p10) }
 0x832   : > { %1842 = vadd.xlane.f32.xlu0 %v1841_v26  ;;  %2681 = vmatprep.subr.bf16.mxu1 (%p1829_p10), %v2526_v50  ;;  %v2524_v24 = vcombine.low (%p1829_p10), %v4275_v63, %v4274_v44  ;;  %v2523_v58 = vcombine.low (%p1829_p10), %v4277_v0, %v4276_v40  ;;  %v4279_v57 = vld [vmem:[#allocation53_spill] sm:$0xff] (%p1829_p10)  ;;  %v4280_v16 = vld [vmem:[#allocation52_spill] sm:$0xff] (%p1829_p10)  ;;  %v4281_v17 = vld [vmem:[#allocation51_spill] sm:$0xff] (%p1829_p10) }
 0x833   :  { %2682 = vmatpush3.bf16.msra.mxu1 (%p1829_p10), %v2526_v50  ;;  %2697 = vmatprep.mubr.bf16.mxu1 (%p1829_p10), %v2515_v48  ;;  %v2522_v59 = vcombine.low (%p1829_p10), %v4279_v57, %v4278_v56  ;;  %v2521_v1 = vcombine.low (%p1829_p10), %v4281_v17, %v4280_v16  ;;  %v4282_v34 = vld [vmem:[#allocation50_spill] sm:$0xff] (%p1829_p10)  ;;  %v4283_v32 = vld [vmem:[#allocation49_spill] sm:$0xff] (%p1829_p10)  ;;  %v4284_v31 = vld [vmem:[#allocation48_spill] sm:$0xff] (%p1829_p10) }
 0x834   :  { %2683 = vmatprep.subr.bf16.mxu1 (%p1829_p10), %v2525_v55  ;;  %v2520_v33 = vcombine.low (%p1829_p10), %v4283_v32, %v4282_v34  ;;  %v4285_v27 = vld [vmem:[#allocation47_spill] sm:$0xff] (%p1829_p10)  ;;  %v4286_v3 = vld [vmem:[#allocation41_spill] sm:$0xff] (%p1829_p10)  ;;  %v4287_v5 = vld [vmem:[#allocation40_spill] sm:$0xff] (%p1829_p10) }
 0x835   :  { %v2519_v2 = vcombine.low (%p1829_p10), %v4285_v27, %v4284_v31  ;;  %v2516_v6 = vcombine.low (%p1829_p10), %v4287_v5, %v4286_v3  ;;  %v4288_v7 = vld [vmem:[#allocation43_spill] sm:$0xff] (%p1829_p10)  ;;  %v4289_v8 = vld [vmem:[#allocation42_spill] sm:$0xff] (%p1829_p10)  ;;  %v4290_v9 = vld [vmem:[#allocation45_spill] sm:$0xff] (%p1829_p10) }
 0x836   : > { %1838 = vadd.xlane.f32.xlu0 %v1837_v51  ;;  %v2517_v4 = vcombine.low (%p1829_p10), %v4289_v8, %v4288_v7  ;;  %v4291_v10 = vld [vmem:[#allocation44_spill] sm:$0xff] (%p1829_p10)  ;;  %v2514_v12 = vld [vmem:[%s4181_s17] ss:$0 sm:$0xff] (%p1829_p10)  ;;  %s3438_s17 = smov (%p1829_p10), 0  }
 0x837   :  { %2684 = vmatpush3.bf16.msra.mxu1 (%p1829_p10), %v2525_v55  ;;  %v2518_v11 = vcombine.low (%p1829_p10), %v4291_v10, %v4290_v9 }
 0x838   :  { %2685 = vmatprep.subr.bf16.mxu1 (%p1829_p10), %v2524_v24 }
 0x83b   :  { %2686 = vmatpush3.bf16.msra.mxu1 (%p1829_p10), %v2524_v24 }
 0x83c   :  { %2687 = vmatprep.subr.bf16.mxu1 (%p1829_p10), %v2523_v58 }
 0x83f   :  { %2688 = vmatpush3.bf16.msra.mxu1 (%p1829_p10), %v2523_v58 }
 0x840   :  { %2689 = vmatprep.subr.bf16.mxu1 (%p1829_p10), %v2522_v59 }
 0x843   :  { %2690 = vmatpush3.bf16.msra.mxu1 (%p1829_p10), %v2522_v59 }
 0x844   :  { %2691 = vmatprep.subr.bf16.mxu1 (%p1829_p10), %v2521_v1 }
 0x847   :  { %2692 = vmatpush3.bf16.msra.mxu1 (%p1829_p10), %v2521_v1 }
 0x848   :  { %2693 = vmatprep.subr.bf16.mxu1 (%p1829_p10), %v2520_v33 }
 0x84b   :  { %2694 = vmatpush3.bf16.msra.mxu1 (%p1829_p10), %v2520_v33 }
 0x84c   :  { %2695 = vmatprep.subr.bf16.mxu1 (%p1829_p10), %v2519_v2 }
 0x84f   :  { %2696 = vmatpush3.bf16.msra.mxu1 (%p1829_p10), %v2519_v2 }
 0x852   :  { %2698 = vmatmul.mubr.bf16.vlgmr.msra.gmra.mxu1 (%p1829_p10), %v2516_v6 }
 0x853   :  { %2701 = vmatprep.mubr.bf16.mxu1 (%p1829_p10), %v2517_v4 }
 0x85a   :  { %2702 = vmatmul.mubr.bf16.gmra.mxu1 (%p1829_p10), %v2518_v11 }
 0x8bb   : > { %v1843_v52 = vpop.xlane.xlu0 %1842 }
 0x8bc   : > { %vm1844_vm9 = vcmp.eq.f32.partialorder %v4273_v25, %v1843_v52  ;;  %vm1845_vm11 = vcmp.gt.f32.partialorder %v1843_v52, 0.0 }
 0x8bd   : > { %vm1848_vm12 = vmand %vm1844_vm9, %vm1845_vm11 }
 0x8bf   : > { %v1839_v61 = vpop.xlane.xlu0 %1838  ;;  %1831 = sbr.rel (!%p1829_p10) target bundleno = 2094 (0x82e), region = 217 }
 0x8c0   : > { %v1849_v54 = vsel %vm1848_vm12, %v1839_v61, 0.0 }
 0x8c1   : > { %v1850_v21 = vadd.f32 %v3428_v22, %v1849_v54  }
 0x8c3   : > { %v3427_v22 = vmov %v1850_v21   ;;  %v1852_v19 = vadd.f32 (%p1829_p10), %v1851_v20, %v1850_v21 }
 0x8c5   :  { %2980 = vlog2.f32 %v1852_v19 }
 0x8d2   :  { %v2981_v41 = vpop.eup %2980 }
 0x8d3   :  { %v1854_v38 = vmul.f32 0.6931472, %v2981_v41 }
 0x8d5   :  { %v1855_v39 = vadd.f32 %v1854_v38, %v1819_v28 }
 0x8d7   :  { %v4063_v29 = vsel %vm886_vm8, %v1855_v39, -1e+30 }
 0x912   :  { %v2699_v13 = vpop.f32.mrf.mxu1 }
 0x913   :  { %v1978_v14 = vadd.f32 %v2699_v13, %v2514_v12 }
 0x914   :  { %v1969_v15 = vpop.f32.mrf.mxu1 }
 0x915   :  { %2982 = vtanh.f32 %v1978_v14  ;;  %v1970_v28 = vadd.f32 %v2514_v12, %v1969_v15  ;;  %v3434_v15 = vmov 0.0  }
 0x916   :  { %v2700_v35 = vpop.f32.mrf.mxu1 }
 0x917   :  { %2984 = vtanh.f32 %v1970_v28  ;;  %v1981_v37 = vadd.f32 %v2700_v35, %v2514_v12 }
 0x918   :  { %v1972_v42 = vpop.f32.mrf.mxu1 }
 0x919   :  { %2986 = vtanh.f32 %v1981_v37  ;;  %v1973_v43 = vadd.f32 %v2514_v12, %v1972_v42 }
 0x91a   :  { %v2703_v47 = vpop.f32.mrf.mxu1 }
 0x91b   :  { %2988 = vtanh.f32 %v1973_v43  ;;  %v1994_v22 = vadd.f32 %v2703_v47, %v2514_v12 }
 0x91c   :  { %v1985_v45 = vpop.f32.mrf.mxu1 }
 0x91d   :  { %v1986_v49 = vadd.f32 %v2514_v12, %v1985_v45 }
 0x91e   :  { %v2704_v23 = vpop.f32.mrf.mxu1 }
 0x91f   :  { %2990 = vtanh.f32 %v1986_v49  ;;  %v1997_v26 = vadd.f32 %v2704_v23, %v2514_v12 }
 0x920   :  { %v1988_v60 = vpop.f32.mrf.mxu1  ;;  %2992 = vtanh.f32 %v1994_v22 }
 0x921   :  { %v1989_v51 = vadd.f32 %v2514_v12, %v1988_v60 }
 0x922   :  { %v2983_v52 = vpop.eup %2982 }
 0x923   :  { %2994 = vtanh.f32 %v1989_v51  ;;  %v2010_v25 = vmul.f32 %v2983_v52, %v3854_v53 }
 0x924   :  { %v2985_v61 = vpop.eup %2984  ;;  %2996 = vtanh.f32 %v1997_v26 }
 0x925   :  { %2020 = vadd.xlane.f32.xlu1 %v2010_v25  ;;  %v2008_v54 = vmul.f32 %v2985_v61, %v3854_v53 }
 0x926   :  { %v2987_v21 = vpop.eup %2986 }
 0x927   :  { %2016 = vadd.xlane.f32.xlu0 %v2008_v54  ;;  %v2011_v20 = vmul.f32 %v2987_v21, %v3854_v53 }
 0x928   :  { %v2989_v50 = vpop.eup %2988 }
 0x929   :  { %2022 = vadd.xlane.f32.xlu1 %v2011_v20  ;;  %v2009_v55 = vmul.f32 %v2989_v50, %v3854_v53 }
 0x92b   :  { %2018 = vadd.xlane.f32.xlu0 %v2009_v55 }
 0x92c   :  { %v2991_v19 = vpop.eup %2990 }
 0x92d   :  { %v2012_v48 = vmul.f32 %v2991_v19, %v3854_v53  ;;  %v2993_v44 = vpop.eup %2992 }
 0x92e   :  { %v2014_v40 = vmul.f32 %v2993_v44, %v3854_v53 }
 0x92f   :  { %2024 = vadd.xlane.f32.xlu0 %v2012_v48 }
 0x930   :  { %v2995_v63 = vpop.eup %2994 }
 0x931   :  { %v2013_v24 = vmul.f32 %v2995_v63, %v3854_v53  ;;  %v2997_v0 = vpop.eup %2996 }
 0x932   :  { %v2015_v58 = vmul.f32 %v2997_v0, %v3854_v53 }
 0x933   :  { %2026 = vadd.xlane.f32.xlu1 %v2013_v24  ;;  %2028 = vadd.xlane.f32.xlu0 %v2014_v40 }
 0x937   :  { %2030 = vadd.xlane.f32.xlu1 %v2015_v58 }
 0x9ae   :  { %v2021_v56 = vpop.xlane.xlu1 %2020 }
 0x9af   :  { %v2051_v1 = vrot.slane %v2021_v56, %v3883_v18 }
 0x9b0   :  { %v2017_v57 = vpop.xlane.xlu0 %2016 }
 0x9b1   :  { %v2043_v16 = vrot.slane %v2017_v57, %v3883_v18 }
 0x9b2   :  { %v2023_v41 = vpop.xlane.xlu1 %2022 }
 0x9b3   :  { %v2055_v32 = vrot.slane %v2023_v41, %v3883_v18 }
 0x9b4   :  { %v2019_v59 = vpop.xlane.xlu0 %2018 }
 0x9b5   :  { %v2047_v17 = vrot.slane %v2019_v59, %v3883_v18 }
 0x9b7   :  { %v2072_v38 = vsel %vm1326_vm1, %v2047_v17, %v2043_v16  ;;  %vm2112_vm1 = vcmp.lt.s32.totalorder %v3823_v30, 8 }
 0x9b8   :  { %v2073_v39 = vsel %vm1328_vm2, %v2051_v1, %v2072_v38  ;;  %v2025_v34 = vpop.xlane.xlu0 %2024 }
 0x9b9   :  { %v2059_v33 = vrot.slane %v2025_v34, %v3883_v18  ;;  %v2074_v31 = vsel %vm1330_vm3, %v2055_v32, %v2073_v39 }
 0x9bb   :  { %v2075_v5 = vsel %vm1332_vm4, %v2059_v33, %v2074_v31 }
 0x9bc   :  { %v2027_v27 = vpop.xlane.xlu1 %2026  ;;  %v2029_v2 = vpop.xlane.xlu0 %2028 }
 0x9bd   :  { %v2063_v3 = vrot.slane %v2027_v27, %v3883_v18  ;;  %v2067_v6 = vrot.slane %v2029_v2, %v3883_v18 }
 0x9bf   :  { %v2076_v7 = vsel %vm1334_vm5, %v2063_v3, %v2075_v5 }
 0x9c0   :  { %v2031_v8 = vpop.xlane.xlu1 %2030  ;;  %v2077_v9 = vsel %vm1336_vm6, %v2067_v6, %v2076_v7 }
 0x9c1   :  { %v2071_v4 = vrot.slane %v2031_v8, %v3883_v18 }
 0x9c3   :  { %v2078_v10 = vsel %vm1338_vm7, %v2071_v4, %v2077_v9 }
 0x9c4   :  { %2080 = vxpose.xlu0.b32.start.end [1/1] (short) (narrow) %v2078_v10, 8 }
 0xa40   :  { %v2096_v11 = vpop.trf.xlu0 }
 0xa41   :  { %v2113_v12 = vsel %vm2112_vm1, %v2096_v11, -1e+30 }
 0xa42   :  { %v2114_v13 = vmul.f32 1.442695, %v2113_v12 }
 0xa44   :  { %2998 = vpow2.f32 %v2114_v13 }
 0xa51   :  { %v2999_v14 = vpop.eup %2998 }
 0xa52 LB: > { %v2123_v28 = vstv %s3440_s17  ;;  %vm2126_vm2 = vcmask 64512   ;;  %s2527_s4 = sshll.u32 %s3440_s17, 3  ;;  %s2121_s17 = sadd.s32 1, %s3440_s17   ;;  %s3440_s17 = sphi %s3438_s17, %s2121_s17   ;;  %v3436_v15 = vphi %v3434_v15, %v3435_v15  }
 0xa53   : > { %vm2124_vm3 = vcmp.eq.s32.totalorder %v3823_v30, %v2123_v28  ;;  %s2131_s5 = scalar_lea.vmem [#allocation11], %s2527_s4  ;;  %p2118_p11 = scmp.ge.s32.totalorder %s2121_s17, 8  }
 0xa54   : > { %v2125_v18 = vsel %vm2124_vm3, %v2999_v14, 0.0  ;;  %v2132_v37 = vld [vmem:[%s2131_s5] sm:$0xff]  ;;  %2300 = vst [vmem:[#allocation24] sm:$0xff] (%p2118_p11), %v3854_v53  ;;  %v2138_v49 = vmax.f32 (%p2118_p11), %v3921_v62, %v3951_v36  ;;  %v4292_v51 = vld [vmem:[#allocation74_spill] sm:$0xff] (%p2118_p11)  ;;  %v4293_v52 = vld [vmem:[#allocation73_spill] sm:$0xff] (%p2118_p11)  ;;  %v3463_v7 = vmov (%p2118_p11), 0  }
 0xa55   : > { %v2127_v35 = vsel %vm2126_vm2, %v2125_v18, 0.0  ;;  %v2543_v25 = vcombine.high (%p2118_p11), %v4293_v52, %v4292_v51  ;;  %v2542_v61 = vcombine.low (%p2118_p11), %v4293_v52, %v4292_v51  ;;  %v4294_v54 = vld [vmem:[#allocation72_spill] sm:$0xff] (%p2118_p11)  ;;  %v4295_v53 = vld [vmem:[#allocation71_spill] sm:$0xff] (%p2118_p11)  ;;  %v4296_v30 = vld [vmem:[#allocation70_spill] sm:$0xff] (%p2118_p11)  ;;  %2286 = vmatprep.mubr.bf16.mxu0 (%p2118_p11), %v3463_v7  ;;  %s3464_s12 = smov (%p2118_p11), [#allocation24]  }
 0xa56   : > { %2128 = vadd.xlane.f32.xlu0 %v2127_v35  ;;  %v2541_v21 = vcombine.high (%p2118_p11), %v4295_v53, %v4294_v54  ;;  %v2540_v20 = vcombine.low (%p2118_p11), %v4295_v53, %v4294_v54  ;;  %v4297_v50 = vld [vmem:[#allocation69_spill] sm:$0xff] (%p2118_p11)  ;;  %v4298_v48 = vld [vmem:[#allocation68_spill] sm:$0xff] (%p2118_p11)  ;;  %v4299_v44 = vld [vmem:[#allocation67_spill] sm:$0xff] (%p2118_p11)  ;;  %s2320_s20 = sshll.u32 (%p2118_p11), %s3464_s12, 4  ;;  %s2321_s20 = int_to_ptr.vmem [resolvable:$true] %s2320_s20 }
 0xa57   :  { %2254 = vmatprep.subr.bf16.mxu0 (%p2118_p11), %v2543_v25  ;;  %v2539_v55 = vcombine.high (%p2118_p11), %v4297_v50, %v4296_v30  ;;  %v2538_v19 = vcombine.low (%p2118_p11), %v4297_v50, %v4296_v30  ;;  %v2537_v63 = vcombine.high (%p2118_p11), %v4299_v44, %v4298_v48  ;;  %v2536_v24 = vcombine.low (%p2118_p11), %v4299_v44, %v4298_v48  ;;  %v4301_v31 = vld [vmem:[#allocation65_spill] sm:$0xff] (%p2118_p11)  ;;  %v4302_v2 = vld [vmem:[#allocation64_spill] sm:$0xff] (%p2118_p11)  ;;  %v4303_v3 = vld [vmem:[#allocation63_spill] sm:$0xff] (%p2118_p11)  ;;  %s3274_s27 = scalar_lea.vmem (%p2118_p11), %s2321_s20, 128  ;;  %p3279_p13 = scmp.lt.s32.totalorder (%p2118_p11), %s2321_s20, %s2321_s20 }
 0xa58   :  { %2255 = vmatpush1.bf16.msra.mxu0 (%p2118_p11), %v2542_v61  ;;  %v2533_v5 = vcombine.high (%p2118_p11), %v4303_v3, %v4302_v2  ;;  %v2532_v6 = vcombine.low (%p2118_p11), %v4303_v3, %v4302_v2  ;;  %v4304_v8 = vld [vmem:[#allocation62_spill] sm:$0xff] (%p2118_p11)  ;;  %v4305_v4 = vld [vmem:[#allocation61_spill] sm:$0xff] (%p2118_p11)  ;;  %v4306_v11 = vld [vmem:[#allocation60_spill] sm:$0xff] (%p2118_p11)  ;;  %p3275_p12 = scmp.ne.s32.totalorder (%p2118_p11), %s2321_s20, %s3274_s27  ;;  %p3280_p0 = scmp.lt.s32.totalorder (%p2118_p11), %s3274_s27, %s3274_s27 }
 0xa59   :  { %2256 = vmatprep.subr.bf16.mxu0 (%p2118_p11), %v2541_v21  ;;  %v2531_v9 = vcombine.high (%p2118_p11), %v4305_v4, %v4304_v8  ;;  %v2530_v10 = vcombine.low (%p2118_p11), %v4305_v4, %v4304_v8  ;;  %v4307_v12 = vld [vmem:[#allocation59_spill] sm:$0xff] (%p2118_p11) }
 0xa5a   :  { %v2529_v13 = vcombine.high (%p2118_p11), %v4307_v12, %v4306_v11  ;;  %v2528_v14 = vcombine.low (%p2118_p11), %v4307_v12, %v4306_v11  ;;  %p3281_p1 = por (%p2118_p11), %p3280_p0, %p3279_p13 }
 0xa5c   :  { %2257 = vmatpush1.bf16.msra.mxu0 (%p2118_p11), %v2540_v20  ;;  %p3282_p2 = pnand (%p2118_p11), %p3281_p1, %p3275_p12 }
 0xa5d   :  { %2258 = vmatprep.subr.bf16.mxu0 (%p2118_p11), %v2539_v55 }
 0xa60   :  { %2259 = vmatpush1.bf16.msra.mxu0 (%p2118_p11), %v2538_v19 }
 0xa61   :  { %2260 = vmatprep.subr.bf16.mxu0 (%p2118_p11), %v2537_v63 }
 0xa64   :  { %2261 = vmatpush1.bf16.msra.mxu0 (%p2118_p11), %v2536_v24 }
 0xadf   : > { %v2129_v42 = vpop.xlane.xlu0 %2128 }
 0xae0   : > { %v2133_v43 = vmul.f32 %v2132_v37, %v2129_v42  ;;  %2120 = sbr.rel (!%p2118_p11) target bundleno = 2642 (0xa52), region = 228 }
 0xae2   : > { %v2134_v47 = vadd.f32 %v3436_v15, %v2133_v43  }
 0xae4   : > { %v3435_v15 = vmov %v2134_v47   ;;  %3000 = vlog2.f32 (%p2118_p11), %v2134_v47 }
 0xaf1   :  { %v3001_v45 = vpop.eup %3000 }
 0xaf2   :  { %v2136_v22 = vmul.f32 0.6931472, %v3001_v45 }
 0xaf4   :  { %v2137_v23 = vsel %vm886_vm8, %v2136_v22, -1e+30 }
 0xaf5   :  { %v2139_v60 = vmax.f32 %v4063_v29, %v2137_v23 }
 0xaf7   :  { %v2140_v26 = vmax.f32 %v2138_v49, %v2139_v60 }
 0xaf9   :  { %2141 = vmax.xlane.f32.xlu0 %v2140_v26 }
 0xb82   :  { %v2142_v40 = vpop.xlane.xlu0 %2141 }
 0xb83   :  { %v2143_v0 = vsub.f32 %v3921_v62, %v2142_v40  ;;  %v2146_v58 = vsub.f32 %v3951_v36, %v2142_v40  ;;  %v2150_v56 = vsub.f32 %v4063_v29, %v2142_v40  ;;  %v2154_v57 = vsub.f32 %v2137_v23, %v2142_v40  ;;  %v4300_v36 = vld [vmem:[#allocation66_spill] sm:$0xff] }
 0xb84   :  { %v2535_v29 = vcombine.high %v4301_v31, %v4300_v36  ;;  %v2534_v27 = vcombine.low %v4301_v31, %v4300_v36 }
 0xb85   :  { %v2144_v59 = vmul.f32 1.442695, %v2143_v0  ;;  %v2147_v16 = vmul.f32 1.442695, %v2146_v58  ;;  %v2151_v17 = vmul.f32 1.442695, %v2150_v56 }
 0xb86   :  { %v2155_v1 = vmul.f32 1.442695, %v2154_v57  ;;  %2262 = vmatprep.subr.bf16.mxu0 %v2535_v29 }
 0xb87   :  { %3002 = vpow2.f32 %v2144_v59  ;;  %2263 = vmatpush1.bf16.msra.mxu0 %v2534_v27 }
 0xb88   :  { %3004 = vpow2.f32 %v2147_v16  ;;  %2264 = vmatprep.subr.bf16.mxu0 %v2533_v5 }
 0xb89   :  { %3006 = vpow2.f32 %v2151_v17 }
 0xb8a   :  { %3008 = vpow2.f32 %v2155_v1 }
 0xb8b   :  { %2265 = vmatpush1.bf16.msra.mxu0 %v2532_v6 }
 0xb8c   :  { %2266 = vmatprep.subr.bf16.mxu0 %v2531_v9 }
 0xb8f   :  { %2267 = vmatpush1.bf16.msra.mxu0 %v2530_v10 }
 0xb90   :  { %2268 = vmatprep.subr.bf16.mxu0 %v2529_v13 }
 0xb93   :  { %2269 = vmatpush1.bf16.msra.mxu0 %v2528_v14 }
 0xb94   :  { %v3003_v41 = vpop.eup %3002 }
 0xb95   :  { %v3005_v38 = vpop.eup %3004 }
 0xb96   :  { %v2149_v39 = vadd.f32 %v3005_v38, %v3003_v41  ;;  %v3007_v34 = vpop.eup %3006 }
 0xb97   :  { %v3009_v33 = vpop.eup %3008 }
 0xb98   :  { %v2153_v32 = vadd.f32 %v3007_v34, %v2149_v39 }
 0xb9a   :  { %v2157_v62 = vadd.f32 %v3009_v33, %v2153_v32 }
 0xb9c   :  { %2158 = vadd.xlane.f32.xlu0 %v2157_v62 }
 0xc25   :  { %v2159_v15 = vpop.xlane.xlu0 %2158 }
 0xc26   :  { %3010 = vrcp.f32 %v2159_v15 }
 0xc33   :  { %v3011_v28 = vpop.eup %3010 }
 0xc34   :  { %v2161_v18 = vmul.f32 %v3011_v28, %v2157_v62 }
 0xc36   :  { %v2162_v35 = vpack.c.bf16 %v2161_v18, %v2161_v18  ;;  %2301 = vst [vmem:[#allocation26] sm:$0xff] %v2161_v18 }
 0xc38   :  { %2287 = vmatmul.mubr.bf16.vlgmr.msra.gmra.mxu0 %v2162_v35 }
 0xc39   :  { %3285 = shalt.err (!%p3282_p2)
}
 0xc3a   :  { %2323 = dma.vmem_to_hbm [thread:$0]  %s2321_s20, 128, %s4185_s21, [#allocation25]  }
 0xc3b   :  { %s3465_s29 = smov [#allocation26]  }
 0xc3c   :  { %s2330_s0 = sshll.u32 %s3465_s29, 4  ;;  %s2331_s0 = int_to_ptr.vmem [resolvable:$true] %s2330_s0 }
 0xc3d   :  { %s3294_s14 = scalar_lea.vmem %s2331_s0, 128  ;;  %p3299_p4 = scmp.lt.s32.totalorder %s2331_s0, %s2331_s0 }
 0xc3e   :  { %p3295_p3 = scmp.ne.s32.totalorder %s2331_s0, %s3294_s14  ;;  %p3300_p5 = scmp.lt.s32.totalorder %s3294_s14, %s3294_s14 }
 0xc40   :  { %p3301_p6 = por %p3300_p5, %p3299_p4 }
 0xc42   :  { %p3302_p7 = pnand %p3301_p6, %p3295_p3 }
 0xc44   :  { %3305 = shalt.err (!%p3302_p7)
}
 0xc45   :  { %2333 = dma.vmem_to_hbm [thread:$0]  %s2331_s0, 128, %s4186_s22, [#allocation25]   ;;  %v4308_v37 = vsub.s32 0, %v3826_v46  ;;  %v4309_v42 = vld [vmem:[#allocation75_spill] sm:$0xff]  ;;  %v4310_v47 = vsub.s32 1, %v3826_v46 }
 0xc46   :  { %s3466_s7 = smov [#allocation27]   ;;  %s3467_s3 = smov [#allocation29]  }
 0xc47   :  { %v2167_v43 = vrot.slane %v4309_v42, %v4308_v37  ;;  %s2340_s21 = sshll.u32 %s3466_s7, 4  ;;  %v2171_v45 = vrot.slane %v4309_v42, %v4310_v47  ;;  %s2350_s19 = sshll.u32 %s3467_s3, 4  ;;  %s2341_s21 = int_to_ptr.vmem [resolvable:$true] %s2340_s21  ;;  %s2351_s19 = int_to_ptr.vmem [resolvable:$true] %s2350_s19 }
 0xc48   :  { %s3314_s22 = scalar_lea.vmem %s2341_s21, 128  ;;  %p3319_p9 = scmp.lt.s32.totalorder %s2341_s21, %s2341_s21 }
 0xc49   :  { %p3315_p8 = scmp.ne.s32.totalorder %s2341_s21, %s3314_s22  ;;  %p3320_p10 = scmp.lt.s32.totalorder %s3314_s22, %s3314_s22 }
 0xc4b   :  { %p3321_p11 = por %p3320_p10, %p3319_p9 }
 0xc4d   :  { %p3322_p12 = pnand %p3321_p11, %p3315_p8 }
 0xcf8   :  { %v2288_v22 = vpop.f32.mrf.mxu0 }
 0xcf9   :  { %v2289_v49 = vadd.f32 %v2288_v22, %v2167_v43 }
 0xcfa   :  { %v2290_v23 = vpop.f32.mrf.mxu0 }
 0xcfb   :  { %2302 = vst [vmem:[#allocation27] sm:$0xff] %v2289_v49  ;;  %v2291_v60 = vadd.f32 %v2290_v23, %v2171_v45 }
 0xcfc   :  { %v2292_v26 = vpop.f32.mrf.mxu0 }
 0xcfd   :  { %3325 = shalt.err (!%p3322_p12)
}
 0xcfe   :  { %2343 = dma.vmem_to_hbm [thread:$0]  %s2341_s21, 128, %s4187_s23, [#allocation28]   ;;  %v2295_v46 = vmul.f32 1.442695, %v2291_v60  ;;  %2303 = vst [vmem:[#allocation29] sm:$0xff] %v2291_v60  ;;  %v2293_v51 = vpop.f32.mrf.mxu0 }
 0xcff   :  { %s3334_s25 = scalar_lea.vmem %s2351_s19, 128  ;;  %p3339_p0 = scmp.lt.s32.totalorder %s2351_s19, %s2351_s19 }
 0xd00   :  { %p3335_p13 = scmp.ne.s32.totalorder %s2351_s19, %s3334_s25  ;;  %p3340_p1 = scmp.lt.s32.totalorder %s3334_s25, %s3334_s25 }
 0xd02   :  { %p3341_p2 = por %p3340_p1, %p3339_p0 }
 0xd04   :  { %p3342_p3 = pnand %p3341_p2, %p3335_p13 }
 0xd06   :  { %3345 = shalt.err (!%p3342_p3)
}
 0xd07   :  { %2353 = dma.vmem_to_hbm [thread:$0]  %s2351_s19, 128, %s4188_s24, [#allocation28]   ;;  %3012 = vpow2.f32 %v2295_v46  ;;  %v4311_v25 = vld [vmem:[#allocation46_spill] sm:$0xff] }
 0xd08   :  { %s3468_s11 = smov [#allocation23]  }
 0xd09   :  { %s2310_s28 = sshll.u32 %s3468_s11, 4  ;;  %s2311_s28 = int_to_ptr.vmem [resolvable:$true] %s2310_s28 }
 0xd0a   :  { %s3354_s23 = scalar_lea.vmem %s2311_s28, 128  ;;  %p3359_p5 = scmp.lt.s32.totalorder %s2311_s28, %s2311_s28 }
 0xd0b   :  { %p3355_p4 = scmp.ne.s32.totalorder %s2311_s28, %s3354_s23  ;;  %p3360_p6 = scmp.lt.s32.totalorder %s3354_s23, %s3354_s23 }
 0xd0d   :  { %p3361_p7 = por %p3360_p6, %p3359_p5 }
 0xd0f   :  { %p3362_p8 = pnand %p3361_p7, %p3355_p4 }
 0xd14   :  { %v3013_v52 = vpop.eup %3012 }
 0xd15   :  { %v2297_v61 = vmul.f32 %v3013_v52, %v4311_v25 }
 0xd17   :  { %v2298_v54 = vadd.f32 %v2297_v61, %v2289_v49 }
 0xd19   :  { %2299 = vst [vmem:[#allocation23] sm:$0xff] %v2298_v54 }
 0xd1a   :  { %3365 = shalt.err (!%p3362_p8)
}
 0xd1b   :  { %s4312_s6 = sld [smem:[#allocation85_spill]] }
 0xd21   :  { %2313 = dma.vmem_to_hbm [thread:$0]  %s2311_s28, 128, %s4312_s6, [#allocation4]  }
 0xd22   :  { %3412 = dma.done.wait [#allocation4], 128  }
 0xd23   :  { %3413 = vsyncadd [#allocation4], 4294967168 }
 0xd24   :  { %3414 = dma.done.wait [#allocation25], 256  }
 0xd25   :  { %3415 = vsyncadd [#allocation25], 4294967040 }
 0xd26   :  { %3416 = dma.done.wait [#allocation28], 256  }
 0xd27   :  { %3417 = vsyncadd [#allocation28], 4294967040 }
 0xd28   :  { %2369 = vsyncpa [#allocation3], 1 }
 0xd29   :  { %2370 = vsyncpa [#allocation6], 1 }
 0xd2a   :  { %2371 = vsyncpa [#allocation9], 1 }
 0xd2b   :  { %2372 = vsyncpa [#allocation12], 1 }
 0xd2c   :  { %2373 = vsyncpa [#allocation15], 1 }
 0xd2d   :  { %2374 = vsyncpa [#allocation18], 1 }
 0xd2e   :  { %2375 = vsyncpa [#allocation21], 1 }
 0xd2f   :  { %2376 = vsyncpa [#allocation4], 1 }
 0xd30   :  { %2377 = vsyncpa [#allocation25], 1 }
 0xd31   :  { %2378 = vsyncpa [#allocation28], 1 }

</bundles_post_ra>
